<compile_context>
chip_gen: v6e
topology: v6e:2x2x1
jax: 0.10.0
libtpu: 0.0.40
codegen_flags: <defaults>
</compile_context>

<pallas_src>
import functools

import jax
import jax.numpy as jnp
from jax.experimental import pallas as pl
from jax.experimental.pallas import tpu as pltpu

_SUBLANE = 8
_LANE = 128


def _round_up(x, m):
  return (x + m - 1) // m * m


# ------------------------------- kernel body ----------------------------------
def _temporal_block_body(x_ref, w1_ref, s1_ref, t1_ref, w2_ref, s2_ref, t2_ref,
                         wd_ref, bd_ref, y_ref, xpad_ref, hpad_ref,
                         *, k, d, pad, length, nb, stride_t, pad_lead, n_rows):
  f32, bf16 = jnp.float32, jnp.bfloat16
  c_in = x_ref.shape[-1]
  c_in_p = xpad_ref.shape[-1]
  c_out_p = hpad_ref.shape[-1]
  gap = stride_t - length          # trailing pad + filler + next sample's leading pad
  s0 = pad_lead - pad              # slab row feeding (virtual) conv-output row 0

  # --- stage x into the bf16, lane/sublane-padded scratch slab -------------------
  # Every slab row is rewritten each grid step (zeros or data, each exactly once), so
  # nothing is gated behind program_id==0 and a parallel grid never reads stale VMEM.
  # All slice starts are static; data regions start at pad_lead + i*stride_t (8-aligned).
  if pad_lead:
    xpad_ref[pl.ds(0, pad_lead), :] = jnp.zeros((pad_lead, c_in_p), bf16)
  zgap_in = jnp.zeros((gap, c_in_p), bf16) if gap else None
  zlane_in = jnp.zeros((length, c_in_p - c_in), bf16) if c_in_p > c_in else None
  for i in range(nb):                              # nb static & small -> unrolled
    di = pad_lead + i * stride_t
    if gap:
      xpad_ref[pl.ds(di + length, gap), :] = zgap_in
    if zlane_in is not None:
      xpad_ref[pl.ds(di, length), pl.ds(0, c_in)] = x_ref[i].astype(bf16)
      xpad_ref[pl.ds(di, length), pl.ds(c_in, c_in_p - c_in)] = zlane_in
    else:
      xpad_ref[pl.ds(di, length), :] = x_ref[i].astype(bf16)

  def dilated_conv(src_ref, w_ref):
    # Per-tap MXU matmuls fed straight from the bf16 scratch ref (no slab-sized value
    # load, no dtype round trips); f32 accumulation.
    # TODO(synk): measure fused (k*C)-wide im2col single-dot variant vs per-tap dots.
    acc = jnp.dot(src_ref[pl.ds(s0, n_rows), :], w_ref[0],
                  preferred_element_type=f32)
    for j in range(1, k):                          # k, d static -> unrolled
      acc += jnp.dot(src_ref[pl.ds(s0 + j * d, n_rows), :], w_ref[j],
                     preferred_element_type=f32)
    return acc

  # conv1 (bias + eval-mode BN folded into s1/t1) -> ReLU
  h1 = jnp.maximum(dilated_conv(xpad_ref, w1_ref) * s1_ref[...] + t1_ref[...], 0.0)
  # TODO(synk): dropout layers are no-ops (inference / eval mode).

  # --- stage h1 into the second bf16 padded slab (same layout) -------------------
  if pad_lead:
    hpad_ref[pl.ds(0, pad_lead), :] = jnp.zeros((pad_lead, c_out_p), bf16)
  zgap_out = jnp.zeros((gap, c_out_p), bf16) if gap else None
  for i in range(nb):
    di = pad_lead + i * stride_t
    if gap:
      hpad_ref[pl.ds(di + length, gap), :] = zgap_out
    hpad_ref[pl.ds(di, length), :] = (
        h1[i * stride_t: i * stride_t + length].astype(bf16))

  # conv2 -> ReLU
  h2 = jnp.maximum(dilated_conv(hpad_ref, w2_ref) * s2_ref[...] + t2_ref[...], 0.0)

  # residual branch: identity when C_in == C_out (no wasted MXU pass), else 1x1 conv;
  # read straight from the aligned data rows of the scratch slab.
  x_rows = xpad_ref[pl.ds(pad_lead, n_rows), :]
  if wd_ref is None:
    res = x_rows.astype(f32)
  else:
    res = jnp.dot(x_rows, wd_ref[...], preferred_element_type=f32) + bd_ref[...]

  out = jnp.maximum(h2 + res, 0.0)
  for i in range(nb):                              # aligned, lane-dense stores
    y_ref[i] = out[i * stride_t: i * stride_t + length].astype(y_ref.dtype)


def _make_kernel(*, k, d, pad, length, nb, stride_t, pad_lead, n_rows, has_down):
  body = functools.partial(_temporal_block_body, k=k, d=d, pad=pad, length=length,
                           nb=nb, stride_t=stride_t, pad_lead=pad_lead,
                           n_rows=n_rows)
  if has_down:
    def kernel(x_ref, w1_ref, s1_ref, t1_ref, w2_ref, s2_ref, t2_ref,
               wd_ref, bd_ref, y_ref, xpad_ref, hpad_ref):
      body(x_ref, w1_ref, s1_ref, t1_ref, w2_ref, s2_ref, t2_ref,
           wd_ref, bd_ref, y_ref, xpad_ref, hpad_ref)
  else:
    def kernel(x_ref, w1_ref, s1_ref, t1_ref, w2_ref, s2_ref, t2_ref,
               y_ref, xpad_ref, hpad_ref):
      body(x_ref, w1_ref, s1_ref, t1_ref, w2_ref, s2_ref, t2_ref,
           None, None, y_ref, xpad_ref, hpad_ref)
  return kernel


# --------------------------------- wrapper ------------------------------------
def temporal_block(x_nlc, p, *, kernel_size, dilation, padding, stride=1,
                   batch_block=None, out_dtype=jnp.bfloat16):
  """x_nlc: (N, L, C_in) f32 -> (N, L, C_out) out_dtype."""
  if stride != 1:
    raise NotImplementedError("stride != 1 breaks the residual add in the module")
  N, L, Cin = x_nlc.shape
  k, d, pad = kernel_size, dilation, padding
  if 2 * pad != d * (k - 1):
    raise ValueError("out + res requires 2*padding == dilation*(kernel_size-1)")

  kdim, Cin_p, Cout_p = p["w1"].shape
  assert kdim == k, "kernel_size mismatch with prepared weights"
  Cout = int(p["c_out"])
  has_down = "wd" in p
  if not has_down and Cin != Cout:
    raise ValueError("identity residual requires C_in == C_out")

  # NOTE: on v7x (2 TensorCores) pick batch_block so grid=N//nb is a multiple of 2;
  # on v6e/v5e (1 TC) prefer the largest nb that fits VMEM (bigger per-step M).
  nb = N if batch_block is None else batch_block
  if N % nb:
    raise ValueError("batch must be divisible by batch_block")

  stride_t = _round_up(L + pad, _SUBLANE)   # per-sample row stride, 8-aligned
  pad_lead = _round_up(pad, _SUBLANE)       # aligned leading-pad region for sample 0
  total_rows = pad_lead + nb * stride_t     # slab rows (all rewritten every step)
  n_rows = (nb - 1) * stride_t + L          # conv-output rows computed per step

  names = ["w1", "s1", "t1", "w2", "s2", "t2"] + (["wd", "bd"] if has_down else [])
  params = [p[name] for name in names]

  def full_spec(a):
    nd = a.ndim
    return pl.BlockSpec(a.shape, lambda n, _nd=nd: (0,) * _nd)

  in_specs = [pl.BlockSpec((nb, L, Cin), lambda n: (n, 0, 0))]
  in_specs += [full_spec(a) for a in params]

  kernel = _make_kernel(k=k, d=d, pad=pad, length=L, nb=nb, stride_t=stride_t,
                        pad_lead=pad_lead, n_rows=n_rows, has_down=has_down)

  # Explicit scoped-VMEM budget (above the 16/32 MiB defaults, capped within v7x's
  # 64 MiB physical).  TODO(synk): time-tile with halo when this exceeds the cap.
  est = (2 * nb * L * Cin * x_nlc.dtype.itemsize            # in-block (double-buffered)
         + 2 * nb * L * Cout_p * jnp.dtype(out_dtype).itemsize  # out-block (dbl-buf)
         + 2 * total_rows * (Cin_p + Cout_p)                 # bf16 scratch slabs
         + 2 * sum(int(a.size) * a.dtype.itemsize for a in params))
  vmem_limit = int(min(64 << 20, max(32 << 20, 2 * est)))

  y_pad = pl.pallas_call(
      kernel,
      out_shape=jax.ShapeDtypeStruct((N, L, Cout_p), out_dtype),
      grid_spec=pltpu.PrefetchScalarGridSpec(
          num_scalar_prefetch=0,
          grid=(N // nb,),
          in_specs=in_specs,
          out_specs=pl.BlockSpec((nb, L, Cout_p), lambda n: (n, 0, 0)),
          scratch_shapes=[pltpu.VMEM((total_rows, Cin_p), jnp.bfloat16),
                          pltpu.VMEM((total_rows, Cout_p), jnp.bfloat16)],
      ),
      compiler_params=pltpu.CompilerParams(
          dimension_semantics=("parallel",),     # batch blocks are independent
          vmem_limit_bytes=vmem_limit),
  )(x_nlc, *params)
  # Drop lane padding outside the kernel (fuses with the downstream transpose).
  return y_pad[..., :Cout]


def temporal_block_nochomp_forward(x_ncl, p, **kw):
  """PyTorch-facing forward: (N, C_in, L) -> (N, C_out, L).

  TODO(synk): when stacking blocks keep activations in NLC and call temporal_block
  directly; the NCL<->NLC transposes here are per-block HBM copies."""
  x_nlc = jnp.transpose(x_ncl, (0, 2, 1))
  return jnp.transpose(temporal_block(x_nlc, p, **kw), (0, 2, 1))


# --------------------------- parameter init / prep -----------------------------
def make_raw_block_params(key, c_in, c_out, kernel_size, *, bool_bn):
  ks = jax.random.split(key, 16)

  def wn_conv(kv, kg, cin, cout):
    # weight_norm: W = g * v / ||v||, norm over (cin, k) per output channel.
    fan_out = cout * kernel_size
    v = jax.random.normal(kv, (cout, cin, kernel_size), jnp.float32) * jnp.sqrt(2.0 / fan_out)
    g = 1.0 + 0.1 * jax.random.normal(kg, (cout,), jnp.float32)
    norm = jnp.sqrt(jnp.sum(v * v, axis=(1, 2), keepdims=True))
    return g[:, None, None] * v / norm           # effective weight (cout, cin, k)

  raw = dict(
      w1=wn_conv(ks[0], ks[1], c_in, c_out),
      b1=0.1 * jax.random.normal(ks[2], (c_out,), jnp.float32),
      w2=wn_conv(ks[3], ks[4], c_out, c_out),
      b2=0.1 * jax.random.normal(ks[5], (c_out,), jnp.float32),
  )
  if bool_bn:
    # eval-mode running stats (fresh PyTorch init would be gamma=1, beta=0, mean=0,
    # var=1; random values here exercise the folding math).
    raw.update(
        g1=1.0 + 0.1 * jax.random.normal(ks[6], (c_out,), jnp.float32),
        be1=0.1 * jax.random.normal(ks[7], (c_out,), jnp.float32),
        m1=0.1 * jax.random.normal(ks[8], (c_out,), jnp.float32),
        v1=1.0 + 0.2 * jax.random.uniform(ks[9], (c_out,), jnp.float32),
        g2=1.0 + 0.1 * jax.random.normal(ks[10], (c_out,), jnp.float32),
        be2=0.1 * jax.random.normal(ks[11], (c_out,), jnp.float32),
        m2=0.1 * jax.random.normal(ks[12], (c_out,), jnp.float32),
        v2=1.0 + 0.2 * jax.random.uniform(ks[13], (c_out,), jnp.float32),
    )
  if c_in != c_out:
    raw["wd"] = jax.random.normal(ks[14], (c_out, c_in), jnp.float32) * jnp.sqrt(2.0 / c_out)
    raw["bd"] = 0.1 * jax.random.normal(ks[15], (c_out,), jnp.float32)
  return raw


def prepare_block_params(raw, *, bool_bn, eps=1e-5, lane=_LANE):
  """Fold conv bias + eval-mode BN into per-channel scale/shift; bf16, 128-lane-padded."""
  bf16 = jnp.bfloat16
  c_out, c_in, _k = raw["w1"].shape
  c_in_p, c_out_p = _round_up(c_in, lane), _round_up(c_out, lane)

  def fold(idx):
    b = raw[f"b{idx}"]
    if bool_bn:
      s = raw[f"g{idx}"] / jnp.sqrt(raw[f"v{idx}"] + eps)
      t = (b - raw[f"m{idx}"]) * s + raw[f"be{idx}"]
    else:
      s, t = jnp.ones_like(b), b
    padc = c_out_p - c_out
    return (jnp.pad(s, (0, padc)).reshape(1, -1),
            jnp.pad(t, (0, padc)).reshape(1, -1))

  def pad_w(w, cin_r, cin_p):
    # (cout, cin, k) -> (k, cin, cout) -> zero-pad channels to lane multiples, bf16.
    w = jnp.transpose(w, (2, 1, 0))
    return jnp.pad(w, ((0, 0), (0, cin_p - cin_r), (0, c_out_p - c_out))).astype(bf16)

  p = dict(w1=pad_w(raw["w1"], c_in, c_in_p),
           w2=pad_w(raw["w2"], c_out, c_out_p),
           c_out=c_out)
  p["s1"], p["t1"] = fold(1)
  p["s2"], p["t2"] = fold(2)
  if "wd" in raw:
    p["wd"] = jnp.pad(raw["wd"].T, ((0, c_in_p - c_in), (0, c_out_p - c_out))).astype(bf16)
    p["bd"] = jnp.pad(raw["bd"], (0, c_out_p - c_out)).reshape(1, -1)
  return p


# ------------------------- independent JAX reference ---------------------------
def ref_temporal_block(x_ncl, raw, *, dilation, padding, bool_bn, eps=1e-5):
  q = lambda a: a.astype(jnp.bfloat16).astype(jnp.float32)   # mimic kernel's bf16 I/O

  def conv(h, w, b):
    y = jax.lax.conv_general_dilated(
        h, q(w), window_strides=(1,), padding=[(padding, padding)],
        rhs_dilation=(dilation,), dimension_numbers=("NCH", "OIH", "NCH"))
    return y + b.reshape(1, -1, 1)

  def bn(h, idx):
    if not bool_bn:
      return h
    g, be = raw[f"g{idx}"].reshape(1, -1, 1), raw[f"be{idx}"].reshape(1, -1, 1)
    m, v = raw[f"m{idx}"].reshape(1, -1, 1), raw[f"v{idx}"].reshape(1, -1, 1)
    return (h - m) / jnp.sqrt(v + eps) * g + be

  x = q(x_ncl)
  h1 = jax.nn.relu(bn(conv(x, raw["w1"], raw["b1"]), 1))
  h1 = q(h1)                # kernel feeds the intermediate activation to the MXU in bf16
  h2 = jax.nn.relu(bn(conv(h1, raw["w2"], raw["b2"]), 2))
  if "wd" in raw:
    res = jnp.einsum("ncl,oc->nol", x, q(raw["wd"])) + raw["bd"].reshape(1, -1, 1)
  else:
    res = x
  return jax.nn.relu(h2 + res)


# ----------------------------------- main --------------------------------------
if __name__ == "__main__":
  key = jax.random.PRNGKey(0)
  k_xa, k_xb, k_pa, k_pb = jax.random.split(key, 4)

  kernel_size, N, L = 3, 4, 32

  # Block A: C_in != C_out (1x1 downsample residual), BatchNorm on, dilation 2.
  Cin_a, Cout_a, dil_a, pad_a = 8, 16, 2, 2
  x_a = jax.random.normal(k_xa, (N, Cin_a, L), jnp.float32)       # PyTorch NCL layout
  raw_a = make_raw_block_params(k_pa, Cin_a, Cout_a, kernel_size, bool_bn=True)
  prep_a = prepare_block_params(raw_a, bool_bn=True)
  y_a = jax.block_until_ready(temporal_block_nochomp_forward(
      x_a, prep_a, kernel_size=kernel_size, dilation=dil_a, padding=pad_a,
      batch_block=2))                                             # grid=2 (v7x-even)
  y_a_ref = ref_temporal_block(x_a, raw_a, dilation=dil_a, padding=pad_a, bool_bn=True)
  assert y_a.shape == (N, Cout_a, L), y_a.shape
  if not bool(jnp.allclose(y_a.astype(jnp.float32), y_a_ref, atol=2e-2, rtol=2e-2)):
    raise AssertionError("block A (downsample + BN) does not match JAX reference")

  # Block B: C_in == C_out (identity residual, no matmul), no BN, dilation 1.
  Cin_b = Cout_b = 16
  dil_b = pad_b = 1
  x_b = jax.random.normal(k_xb, (N, Cin_b, L), jnp.float32)
  raw_b = make_raw_block_params(k_pb, Cin_b, Cout_b, kernel_size, bool_bn=False)
  prep_b = prepare_block_params(raw_b, bool_bn=False)
  y_b = jax.block_until_ready(temporal_block_nochomp_forward(
      x_b, prep_b, kernel_size=kernel_size, dilation=dil_b, padding=pad_b,
      batch_block=2))
  y_b_ref = ref_temporal_block(x_b, raw_b, dilation=dil_b, padding=pad_b, bool_bn=False)
  assert y_b.shape == (N, Cout_b, L), y_b.shape
  if not bool(jnp.allclose(y_b.astype(jnp.float32), y_b_ref, atol=2e-2, rtol=2e-2)):
    raise AssertionError("block B (identity residual, no BN) does not match JAX reference")

  print("KERNEL_OK")
</pallas_src>

<mosaic_0001>
module attributes {stable_mosaic.version = 11 : i64} {
  func.func @kernel(%arg0: i32, %arg1: memref<2x32x8xf32, #tpu.memory_space<vmem>>, %arg2: memref<3x128x128xbf16, #tpu.memory_space<vmem>>, %arg3: memref<1x128xf32, #tpu.memory_space<vmem>>, %arg4: memref<1x128xf32, #tpu.memory_space<vmem>>, %arg5: memref<3x128x128xbf16, #tpu.memory_space<vmem>>, %arg6: memref<1x128xf32, #tpu.memory_space<vmem>>, %arg7: memref<1x128xf32, #tpu.memory_space<vmem>>, %arg8: memref<128x128xbf16, #tpu.memory_space<vmem>>, %arg9: memref<1x128xf32, #tpu.memory_space<vmem>>, %arg10: memref<2x32x128xbf16, #tpu.memory_space<vmem>>, %arg11: memref<88x128xbf16, #tpu.memory_space<vmem>>, %arg12: memref<88x128xbf16, #tpu.memory_space<vmem>>) attributes {dimension_semantics = [#tpu.dimension_semantics<parallel>], iteration_bounds = array<i64: 2>, scalar_prefetch = 0 : i64, scratch_operands = 2 : i64, tpu.core_type = #tpu.core_type<tc>, window_params = [{transform_indices = @transform_0, window_bounds = array<i64: 2, 32, 8>}, {pipeline_mode = #tpu.pipeline_mode<synchronous>, transform_indices = @transform_1, window_bounds = array<i64: 3, 128, 128>}, {pipeline_mode = #tpu.pipeline_mode<synchronous>, transform_indices = @transform_2, window_bounds = array<i64: 1, 128>}, {pipeline_mode = #tpu.pipeline_mode<synchronous>, transform_indices = @transform_3, window_bounds = array<i64: 1, 128>}, {pipeline_mode = #tpu.pipeline_mode<synchronous>, transform_indices = @transform_4, window_bounds = array<i64: 3, 128, 128>}, {pipeline_mode = #tpu.pipeline_mode<synchronous>, transform_indices = @transform_5, window_bounds = array<i64: 1, 128>}, {pipeline_mode = #tpu.pipeline_mode<synchronous>, transform_indices = @transform_6, window_bounds = array<i64: 1, 128>}, {pipeline_mode = #tpu.pipeline_mode<synchronous>, transform_indices = @transform_7, window_bounds = array<i64: 128, 128>}, {pipeline_mode = #tpu.pipeline_mode<synchronous>, transform_indices = @transform_8, window_bounds = array<i64: 1, 128>}, {transform_indices = @transform_9, window_bounds = array<i64: 2, 32, 128>}]} {
    %cst = arith.constant 0.000000e+00 : bf16
    %0 = vector.broadcast %cst : bf16 to vector<8x128xbf16>
    %c0 = arith.constant 0 : index
    %c0_0 = arith.constant 0 : index
    %1 = vector.load %arg11[%c0, %c0_0] : memref<88x128xbf16, #tpu.memory_space<vmem>>, vector<8x128xbf16>
    tpu.vector_store %arg11[%c0, %c0_0], %0 {strides = array<i32>} : memref<88x128xbf16, #tpu.memory_space<vmem>>, vector<8x128xbf16>,
    %cst_1 = arith.constant 0.000000e+00 : bf16
    %2 = vector.broadcast %cst_1 : bf16 to vector<8x128xbf16>
    %cst_2 = arith.constant 0.000000e+00 : bf16
    %3 = vector.broadcast %cst_2 : bf16 to vector<32x120xbf16>
    %c40 = arith.constant 40 : index
    %c0_3 = arith.constant 0 : index
    %4 = vector.load %arg11[%c40, %c0_3] : memref<88x128xbf16, #tpu.memory_space<vmem>>, vector<8x128xbf16>
    tpu.vector_store %arg11[%c40, %c0_3], %2 {strides = array<i32>} : memref<88x128xbf16, #tpu.memory_space<vmem>>, vector<8x128xbf16>,
    %c0_4 = arith.constant 0 : index
    %c0_5 = arith.constant 0 : index
    %c0_6 = arith.constant 0 : index
    %5 = vector.load %arg1[%c0_4, %c0_5, %c0_6] : memref<2x32x8xf32, #tpu.memory_space<vmem>>, vector<1x32x8xf32>
    %6 = vector.shape_cast %5 : vector<1x32x8xf32> to vector<32x8xf32>
    %7 = arith.truncf %6 : vector<32x8xf32> to vector<32x8xbf16>
    %c8 = arith.constant 8 : index
    %c0_7 = arith.constant 0 : index
    %8 = vector.load %arg11[%c8, %c0_7] : memref<88x128xbf16, #tpu.memory_space<vmem>>, vector<32x8xbf16>
    tpu.vector_store %arg11[%c8, %c0_7], %7 {strides = array<i32>} : memref<88x128xbf16, #tpu.memory_space<vmem>>, vector<32x8xbf16>,
    %c8_8 = arith.constant 8 : index
    %c8_9 = arith.constant 8 : index
    %9 = vector.load %arg11[%c8_8, %c8_9] : memref<88x128xbf16, #tpu.memory_space<vmem>>, vector<32x120xbf16>
    tpu.vector_store %arg11[%c8_8, %c8_9], %3 {strides = array<i32>} : memref<88x128xbf16, #tpu.memory_space<vmem>>, vector<32x120xbf16>,
    %c80 = arith.constant 80 : index
    %c0_10 = arith.constant 0 : index
    %10 = vector.load %arg11[%c80, %c0_10] : memref<88x128xbf16, #tpu.memory_space<vmem>>, vector<8x128xbf16>
    tpu.vector_store %arg11[%c80, %c0_10], %2 {strides = array<i32>} : memref<88x128xbf16, #tpu.memory_space<vmem>>, vector<8x128xbf16>,
    %c1 = arith.constant 1 : index
    %c0_11 = arith.constant 0 : index
    %c0_12 = arith.constant 0 : index
    %11 = vector.load %arg1[%c1, %c0_11, %c0_12] : memref<2x32x8xf32, #tpu.memory_space<vmem>>, vector<1x32x8xf32>
    %12 = vector.shape_cast %11 : vector<1x32x8xf32> to vector<32x8xf32>
    %13 = arith.truncf %12 : vector<32x8xf32> to vector<32x8xbf16>
    %c48 = arith.constant 48 : index
    %c0_13 = arith.constant 0 : index
    %14 = vector.load %arg11[%c48, %c0_13] : memref<88x128xbf16, #tpu.memory_space<vmem>>, vector<32x8xbf16>
    tpu.vector_store %arg11[%c48, %c0_13], %13 {strides = array<i32>} : memref<88x128xbf16, #tpu.memory_space<vmem>>, vector<32x8xbf16>,
    %c48_14 = arith.constant 48 : index
    %c8_15 = arith.constant 8 : index
    %15 = vector.load %arg11[%c48_14, %c8_15] : memref<88x128xbf16, #tpu.memory_space<vmem>>, vector<32x120xbf16>
    tpu.vector_store %arg11[%c48_14, %c8_15], %3 {strides = array<i32>} : memref<88x128xbf16, #tpu.memory_space<vmem>>, vector<32x120xbf16>,
    %c6 = arith.constant 6 : index
    %c0_16 = arith.constant 0 : index
    %16 = vector.load %arg11[%c6, %c0_16] : memref<88x128xbf16, #tpu.memory_space<vmem>>, vector<72x128xbf16>
    %c0_17 = arith.constant 0 : index
    %c0_18 = arith.constant 0 : index
    %c0_19 = arith.constant 0 : index
    %17 = vector.load %arg2[%c0_17, %c0_18, %c0_19] : memref<3x128x128xbf16, #tpu.memory_space<vmem>>, vector<1x128x128xbf16>
    %18 = vector.shape_cast %17 : vector<1x128x128xbf16> to vector<128x128xbf16>
    %cst_20 = arith.constant dense<0.000000e+00> : vector<72x128xf32>
    %19 = tpu.matmul %16, %18, %cst_20 {dimension_numbers = #tpu.dot_dimension_numbers<[1], [0], [0], [1], [0, 0, 1, 1], [], []>} : vector<72x128xbf16>, vector<128x128xbf16>, vector<72x128xf32> -> vector<72x128xf32>
    %c8_21 = arith.constant 8 : index
    %c0_22 = arith.constant 0 : index
    %20 = vector.load %arg11[%c8_21, %c0_22] : memref<88x128xbf16, #tpu.memory_space<vmem>>, vector<72x128xbf16>
    %c1_23 = arith.constant 1 : index
    %c0_24 = arith.constant 0 : index
    %c0_25 = arith.constant 0 : index
    %21 = vector.load %arg2[%c1_23, %c0_24, %c0_25] : memref<3x128x128xbf16, #tpu.memory_space<vmem>>, vector<1x128x128xbf16>
    %22 = vector.shape_cast %21 : vector<1x128x128xbf16> to vector<128x128xbf16>
    %cst_26 = arith.constant dense<0.000000e+00> : vector<72x128xf32>
    %23 = tpu.matmul %20, %22, %cst_26 {dimension_numbers = #tpu.dot_dimension_numbers<[1], [0], [0], [1], [0, 0, 1, 1], [], []>} : vector<72x128xbf16>, vector<128x128xbf16>, vector<72x128xf32> -> vector<72x128xf32>
    %24 = arith.addf %19, %23 : vector<72x128xf32>
    %c10 = arith.constant 10 : index
    %c0_27 = arith.constant 0 : index
    %25 = vector.load %arg11[%c10, %c0_27] : memref<88x128xbf16, #tpu.memory_space<vmem>>, vector<72x128xbf16>
    %c2 = arith.constant 2 : index
    %c0_28 = arith.constant 0 : index
    %c0_29 = arith.constant 0 : index
    %26 = vector.load %arg2[%c2, %c0_28, %c0_29] : memref<3x128x128xbf16, #tpu.memory_space<vmem>>, vector<1x128x128xbf16>
    %27 = vector.shape_cast %26 : vector<1x128x128xbf16> to vector<128x128xbf16>
    %cst_30 = arith.constant dense<0.000000e+00> : vector<72x128xf32>
    %28 = tpu.matmul %25, %27, %cst_30 {dimension_numbers = #tpu.dot_dimension_numbers<[1], [0], [0], [1], [0, 0, 1, 1], [], []>} : vector<72x128xbf16>, vector<128x128xbf16>, vector<72x128xf32> -> vector<72x128xf32>
    %29 = arith.addf %24, %28 : vector<72x128xf32>
    %c0_31 = arith.constant 0 : index
    %c0_32 = arith.constant 0 : index
    %30 = vector.load %arg3[%c0_31, %c0_32] : memref<1x128xf32, #tpu.memory_space<vmem>>, vector<1x128xf32>
    %31 = vector.broadcast %30 : vector<1x128xf32> to vector<72x128xf32>
    %32 = arith.mulf %29, %31 : vector<72x128xf32>
    %c0_33 = arith.constant 0 : index
    %c0_34 = arith.constant 0 : index
    %33 = vector.load %arg4[%c0_33, %c0_34] : memref<1x128xf32, #tpu.memory_space<vmem>>, vector<1x128xf32>
    %34 = vector.broadcast %33 : vector<1x128xf32> to vector<72x128xf32>
    %35 = arith.addf %32, %34 : vector<72x128xf32>
    %cst_35 = arith.constant 0.000000e+00 : f32
    %36 = vector.broadcast %cst_35 : f32 to vector<72x128xf32>
    %37 = arith.maximumf %35, %36 : vector<72x128xf32>
    %cst_36 = arith.constant 0.000000e+00 : bf16
    %38 = vector.broadcast %cst_36 : bf16 to vector<8x128xbf16>
    %c0_37 = arith.constant 0 : index
    %c0_38 = arith.constant 0 : index
    %39 = vector.load %arg12[%c0_37, %c0_38] : memref<88x128xbf16, #tpu.memory_space<vmem>>, vector<8x128xbf16>
    tpu.vector_store %arg12[%c0_37, %c0_38], %38 {strides = array<i32>} : memref<88x128xbf16, #tpu.memory_space<vmem>>, vector<8x128xbf16>,
    %cst_39 = arith.constant 0.000000e+00 : bf16
    %40 = vector.broadcast %cst_39 : bf16 to vector<8x128xbf16>
    %c40_40 = arith.constant 40 : index
    %c0_41 = arith.constant 0 : index
    %41 = vector.load %arg12[%c40_40, %c0_41] : memref<88x128xbf16, #tpu.memory_space<vmem>>, vector<8x128xbf16>
    tpu.vector_store %arg12[%c40_40, %c0_41], %40 {strides = array<i32>} : memref<88x128xbf16, #tpu.memory_space<vmem>>, vector<8x128xbf16>,
    %42 = vector.extract_strided_slice %37 {offsets = [0, 0], sizes = [32, 128], strides = [1, 1]} : vector<72x128xf32> to vector<32x128xf32>
    %43 = arith.truncf %42 : vector<32x128xf32> to vector<32x128xbf16>
    %c8_42 = arith.constant 8 : index
    %c0_43 = arith.constant 0 : index
    %44 = vector.load %arg12[%c8_42, %c0_43] : memref<88x128xbf16, #tpu.memory_space<vmem>>, vector<32x128xbf16>
    tpu.vector_store %arg12[%c8_42, %c0_43], %43 {strides = array<i32>} : memref<88x128xbf16, #tpu.memory_space<vmem>>, vector<32x128xbf16>,
    %c80_44 = arith.constant 80 : index
    %c0_45 = arith.constant 0 : index
    %45 = vector.load %arg12[%c80_44, %c0_45] : memref<88x128xbf16, #tpu.memory_space<vmem>>, vector<8x128xbf16>
    tpu.vector_store %arg12[%c80_44, %c0_45], %40 {strides = array<i32>} : memref<88x128xbf16, #tpu.memory_space<vmem>>, vector<8x128xbf16>,
    %46 = vector.extract_strided_slice %37 {offsets = [40, 0], sizes = [32, 128], strides = [1, 1]} : vector<72x128xf32> to vector<32x128xf32>
    %47 = arith.truncf %46 : vector<32x128xf32> to vector<32x128xbf16>
    %c48_46 = arith.constant 48 : index
    %c0_47 = arith.constant 0 : index
    %48 = vector.load %arg12[%c48_46, %c0_47] : memref<88x128xbf16, #tpu.memory_space<vmem>>, vector<32x128xbf16>
    tpu.vector_store %arg12[%c48_46, %c0_47], %47 {strides = array<i32>} : memref<88x128xbf16, #tpu.memory_space<vmem>>, vector<32x128xbf16>,
    %c6_48 = arith.constant 6 : index
    %c0_49 = arith.constant 0 : index
    %49 = vector.load %arg12[%c6_48, %c0_49] : memref<88x128xbf16, #tpu.memory_space<vmem>>, vector<72x128xbf16>
    %c0_50 = arith.constant 0 : index
    %c0_51 = arith.constant 0 : index
    %c0_52 = arith.constant 0 : index
    %50 = vector.load %arg5[%c0_50, %c0_51, %c0_52] : memref<3x128x128xbf16, #tpu.memory_space<vmem>>, vector<1x128x128xbf16>
    %51 = vector.shape_cast %50 : vector<1x128x128xbf16> to vector<128x128xbf16>
    %cst_53 = arith.constant dense<0.000000e+00> : vector<72x128xf32>
    %52 = tpu.matmul %49, %51, %cst_53 {dimension_numbers = #tpu.dot_dimension_numbers<[1], [0], [0], [1], [0, 0, 1, 1], [], []>} : vector<72x128xbf16>, vector<128x128xbf16>, vector<72x128xf32> -> vector<72x128xf32>
    %c8_54 = arith.constant 8 : index
    %c0_55 = arith.constant 0 : index
    %53 = vector.load %arg12[%c8_54, %c0_55] : memref<88x128xbf16, #tpu.memory_space<vmem>>, vector<72x128xbf16>
    %c1_56 = arith.constant 1 : index
    %c0_57 = arith.constant 0 : index
    %c0_58 = arith.constant 0 : index
    %54 = vector.load %arg5[%c1_56, %c0_57, %c0_58] : memref<3x128x128xbf16, #tpu.memory_space<vmem>>, vector<1x128x128xbf16>
    %55 = vector.shape_cast %54 : vector<1x128x128xbf16> to vector<128x128xbf16>
    %cst_59 = arith.constant dense<0.000000e+00> : vector<72x128xf32>
    %56 = tpu.matmul %53, %55, %cst_59 {dimension_numbers = #tpu.dot_dimension_numbers<[1], [0], [0], [1], [0, 0, 1, 1], [], []>} : vector<72x128xbf16>, vector<128x128xbf16>, vector<72x128xf32> -> vector<72x128xf32>
    %57 = arith.addf %52, %56 : vector<72x128xf32>
    %c10_60 = arith.constant 10 : index
    %c0_61 = arith.constant 0 : index
    %58 = vector.load %arg12[%c10_60, %c0_61] : memref<88x128xbf16, #tpu.memory_space<vmem>>, vector<72x128xbf16>
    %c2_62 = arith.constant 2 : index
    %c0_63 = arith.constant 0 : index
    %c0_64 = arith.constant 0 : index
    %59 = vector.load %arg5[%c2_62, %c0_63, %c0_64] : memref<3x128x128xbf16, #tpu.memory_space<vmem>>, vector<1x128x128xbf16>
    %60 = vector.shape_cast %59 : vector<1x128x128xbf16> to vector<128x128xbf16>
    %cst_65 = arith.constant dense<0.000000e+00> : vector<72x128xf32>
    %61 = tpu.matmul %58, %60, %cst_65 {dimension_numbers = #tpu.dot_dimension_numbers<[1], [0], [0], [1], [0, 0, 1, 1], [], []>} : vector<72x128xbf16>, vector<128x128xbf16>, vector<72x128xf32> -> vector<72x128xf32>
    %62 = arith.addf %57, %61 : vector<72x128xf32>
    %c0_66 = arith.constant 0 : index
    %c0_67 = arith.constant 0 : index
    %63 = vector.load %arg6[%c0_66, %c0_67] : memref<1x128xf32, #tpu.memory_space<vmem>>, vector<1x128xf32>
    %64 = vector.broadcast %63 : vector<1x128xf32> to vector<72x128xf32>
    %65 = arith.mulf %62, %64 : vector<72x128xf32>
    %c0_68 = arith.constant 0 : index
    %c0_69 = arith.constant 0 : index
    %66 = vector.load %arg7[%c0_68, %c0_69] : memref<1x128xf32, #tpu.memory_space<vmem>>, vector<1x128xf32>
    %67 = vector.broadcast %66 : vector<1x128xf32> to vector<72x128xf32>
    %68 = arith.addf %65, %67 : vector<72x128xf32>
    %cst_70 = arith.constant 0.000000e+00 : f32
    %69 = vector.broadcast %cst_70 : f32 to vector<72x128xf32>
    %70 = arith.maximumf %68, %69 : vector<72x128xf32>
    %c8_71 = arith.constant 8 : index
    %c0_72 = arith.constant 0 : index
    %71 = vector.load %arg11[%c8_71, %c0_72] : memref<88x128xbf16, #tpu.memory_space<vmem>>, vector<72x128xbf16>
    %c0_73 = arith.constant 0 : index
    %c0_74 = arith.constant 0 : index
    %72 = vector.load %arg8[%c0_73, %c0_74] : memref<128x128xbf16, #tpu.memory_space<vmem>>, vector<128x128xbf16>
    %cst_75 = arith.constant dense<0.000000e+00> : vector<72x128xf32>
    %73 = tpu.matmul %71, %72, %cst_75 {dimension_numbers = #tpu.dot_dimension_numbers<[1], [0], [0], [1], [0, 0, 1, 1], [], []>} : vector<72x128xbf16>, vector<128x128xbf16>, vector<72x128xf32> -> vector<72x128xf32>
    %c0_76 = arith.constant 0 : index
    %c0_77 = arith.constant 0 : index
    %74 = vector.load %arg9[%c0_76, %c0_77] : memref<1x128xf32, #tpu.memory_space<vmem>>, vector<1x128xf32>
    %75 = vector.broadcast %74 : vector<1x128xf32> to vector<72x128xf32>
    %76 = arith.addf %73, %75 : vector<72x128xf32>
    %77 = arith.addf %70, %76 : vector<72x128xf32>
    %cst_78 = arith.constant 0.000000e+00 : f32
    %78 = vector.broadcast %cst_78 : f32 to vector<72x128xf32>
    %79 = arith.maximumf %77, %78 : vector<72x128xf32>
    %80 = vector.extract_strided_slice %79 {offsets = [0, 0], sizes = [32, 128], strides = [1, 1]} : vector<72x128xf32> to vector<32x128xf32>
    %81 = arith.truncf %80 : vector<32x128xf32> to vector<32x128xbf16>
    %c0_79 = arith.constant 0 : index
    %c0_80 = arith.constant 0 : index
    %c0_81 = arith.constant 0 : index
    %82 = vector.load %arg10[%c0_79, %c0_80, %c0_81] : memref<2x32x128xbf16, #tpu.memory_space<vmem>>, vector<1x32x128xbf16>
    %83 = vector.shape_cast %82 : vector<1x32x128xbf16> to vector<32x128xbf16>
    %84 = vector.shape_cast %81 : vector<32x128xbf16> to vector<1x32x128xbf16>
    tpu.vector_store %arg10[%c0_79, %c0_80, %c0_81], %84 {strides = array<i32>} : memref<2x32x128xbf16, #tpu.memory_space<vmem>>, vector<1x32x128xbf16>,
    %85 = vector.extract_strided_slice %79 {offsets = [40, 0], sizes = [32, 128], strides = [1, 1]} : vector<72x128xf32> to vector<32x128xf32>
    %86 = arith.truncf %85 : vector<32x128xf32> to vector<32x128xbf16>
    %c1_82 = arith.constant 1 : index
    %c0_83 = arith.constant 0 : index
    %c0_84 = arith.constant 0 : index
    %87 = vector.load %arg10[%c1_82, %c0_83, %c0_84] : memref<2x32x128xbf16, #tpu.memory_space<vmem>>, vector<1x32x128xbf16>
    %88 = vector.shape_cast %87 : vector<1x32x128xbf16> to vector<32x128xbf16>
    %89 = vector.shape_cast %86 : vector<32x128xbf16> to vector<1x32x128xbf16>
    tpu.vector_store %arg10[%c1_82, %c0_83, %c0_84], %89 {strides = array<i32>} : memref<2x32x128xbf16, #tpu.memory_space<vmem>>, vector<1x32x128xbf16>,
    return
  }
  func.func @transform_0(%arg0: i32) -> (i32, i32, i32) {
    %c0_i32 = arith.constant 0 : i32
    %c0_i32_0 = arith.constant 0 : i32
    %c0_i32_1 = arith.constant 0 : i32
    return %arg0, %c0_i32, %c0_i32_0 : i32, i32, i32
  }
  func.func @transform_1(%arg0: i32) -> (i32, i32, i32) {
    %c0_i32 = arith.constant 0 : i32
    %c0_i32_0 = arith.constant 0 : i32
    %c0_i32_1 = arith.constant 0 : i32
    %c0_i32_2 = arith.constant 0 : i32
    return %c0_i32, %c0_i32_0, %c0_i32_1 : i32, i32, i32
  }
  func.func @transform_2(%arg0: i32) -> (i32, i32) {
    %c0_i32 = arith.constant 0 : i32
    %c0_i32_0 = arith.constant 0 : i32
    %c0_i32_1 = arith.constant 0 : i32
    return %c0_i32, %c0_i32_0 : i32, i32
  }
  func.func @transform_3(%arg0: i32) -> (i32, i32) {
    %c0_i32 = arith.constant 0 : i32
    %c0_i32_0 = arith.constant 0 : i32
    %c0_i32_1 = arith.constant 0 : i32
    return %c0_i32, %c0_i32_0 : i32, i32
  }
  func.func @transform_4(%arg0: i32) -> (i32, i32, i32) {
    %c0_i32 = arith.constant 0 : i32
    %c0_i32_0 = arith.constant 0 : i32
    %c0_i32_1 = arith.constant 0 : i32
    %c0_i32_2 = arith.constant 0 : i32
    return %c0_i32, %c0_i32_0, %c0_i32_1 : i32, i32, i32
  }
  func.func @transform_5(%arg0: i32) -> (i32, i32) {
    %c0_i32 = arith.constant 0 : i32
    %c0_i32_0 = arith.constant 0 : i32
    %c0_i32_1 = arith.constant 0 : i32
    return %c0_i32, %c0_i32_0 : i32, i32
  }
  func.func @transform_6(%arg0: i32) -> (i32, i32) {
    %c0_i32 = arith.constant 0 : i32
    %c0_i32_0 = arith.constant 0 : i32
    %c0_i32_1 = arith.constant 0 : i32
    return %c0_i32, %c0_i32_0 : i32, i32
  }
  func.func @transform_7(%arg0: i32) -> (i32, i32) {
    %c0_i32 = arith.constant 0 : i32
    %c0_i32_0 = arith.constant 0 : i32
    %c0_i32_1 = arith.constant 0 : i32
    return %c0_i32, %c0_i32_0 : i32, i32
  }
  func.func @transform_8(%arg0: i32) -> (i32, i32) {
    %c0_i32 = arith.constant 0 : i32
    %c0_i32_0 = arith.constant 0 : i32
    %c0_i32_1 = arith.constant 0 : i32
    return %c0_i32, %c0_i32_0 : i32, i32
  }
  func.func @transform_9(%arg0: i32) -> (i32, i32, i32) {
    %c0_i32 = arith.constant 0 : i32
    %c0_i32_0 = arith.constant 0 : i32
    %c0_i32_1 = arith.constant 0 : i32
    return %arg0, %c0_i32, %c0_i32_0 : i32, i32, i32
  }
}

</mosaic_0001>

<bundles_post_ra>
// kernel: tpu_custom_call.1
= control target key start
LH: loop header
LB: loop body
LE: loop exit
PB: predicated region body
PF: predicated region fallthrough
CT: control target
= control target key end

     0   :  { %14 = vsyncpa [#allocation5], 0  ;;  %s3334_s0 = inlined_call_operand.vmem [shape: f32[4,32,8], index: 0, kind: input, shape index: {}]   ;;  %s3335_s1 = inlined_call_operand.hbm [shape: bf16[3,128,128], index: 1, kind: input, shape index: {}]   ;;  %s3336_s2 = inlined_call_operand.vmem [shape: f32[1,128], index: 2, kind: input, shape index: {}]   ;;  %s3337_s3 = inlined_call_operand.vmem [shape: f32[1,128], index: 3, kind: input, shape index: {}]   ;;  %s3338_s4 = inlined_call_operand.hbm [shape: bf16[3,128,128], index: 4, kind: input, shape index: {}]   ;;  %s3339_s5 = inlined_call_operand.vmem [shape: f32[1,128], index: 5, kind: input, shape index: {}]   ;;  %s3340_s6 = inlined_call_operand.vmem [shape: f32[1,128], index: 6, kind: input, shape index: {}]   ;;  %s3341_s7 = inlined_call_operand.vmem [shape: bf16[128,128], index: 7, kind: input, shape index: {}]   ;;  %s3342_s8 = inlined_call_operand.vmem [shape: f32[1,128], index: 8, kind: input, shape index: {}]   ;;  %s3343_s9 = inlined_call_operand.hbm [shape: bf16[4,32,128], index: 9, kind: output, shape index: {}]  }
   0x1   :  { %15 = vsyncpa [#allocation8], 0 }
   0x2   :  { %16 = vsyncpa [#allocation6], 0 }
   0x3   :  { %18 = vsyncpa [#allocation6 + $0x1], 0  ;;  %s2848_s30 = smov 0   ;;  %s2850_s10 = smov 0  }
   0x4   :  { %s2852_s11 = smov 0   ;;  %s2854_s12 = smov 0  }
   0x5 LB: > { %s2869_s13 = sadd.s32 4294967295, %s2786_s12   ;;  %s1938_s14 = sadd.s32 4294967294, %s2786_s12   ;;  %s2786_s12 = sphi %s2854_s12, %s3357_s12   ;;  %s2782_s11 = sphi %s2852_s11, %s3356_s11   ;;  %s2778_s10 = sphi %s2850_s10, %s3355_s10   ;;  %s2774_s30 = sphi %s2848_s30, %s3354_s30  }
   0x6   : > { %s2873_s15 = sadd.s32 1, %s2786_s12   ;;  %s225_s16 = sadd.s32 1, %s2782_s11 }
   0x7   : > { %s222_s17 = ssub.s32 %s2786_s12, %s2873_s15  ;;  %p235_p0 = scmp.ne.s32.totalorder %s2782_s11, %s2778_s10 }
   0x8   : > { %p223_p1 = scmp.eq.s32.totalorder %s222_s17, 0  ;;  %p236_p2 = scmp.eq.s32.totalorder %s2869_s13, 1 }
   0x9   : > { %p241_p3 = scmp.ne.s32.totalorder %s2778_s10, %s2774_s30  ;;  %p242_p4 = scmp.eq.s32.totalorder %s1938_s14, 1 }
   0xa   : > { %s2884_s18 = scalar_select %p223_p1, %s2782_s11, %s225_s16  }
   0xb   : > { %p2886_p5 = por %p236_p2, %p235_p0  ;;  %p2890_p6 = por %p242_p4, %p241_p3 }
   0xc   : > { %p1939_p7 = scmp.ge.s32.totalorder %s2786_s12, 1  ;;  %p249_p8 = scmp.lt.s32.totalorder %s2786_s12, 3 }
   0xd   : > { %s3346_s20 = scalar_select %p2890_p6, 1, 0 }
   0xe   : > { %p3344_p9 = scmp.eq.s32.totalorder %s2869_s13, 0  ;;  %p2897_p10 = pnand %p1939_p7, %p249_p8 }
   0xf   : > { %s2788_s22 = smov [#allocation4]   ;;  %s2789_s25 = smov [#allocation7]  }
  0x10   : > { %s261_s23 = sshll.u32 %s2788_s22, 4  ;;  %p2521_p11 = pneg %p2897_p10  ;;  %s262_s23 = int_to_ptr.vmem [resolvable:$true] %s261_s23 }
  0x11   : > { %s280_s26 = sshll.u32 %s2789_s25, 4  ;;  %s2677_s27 = scalar_lea.vmem %s262_s23, 3072  ;;  %s281_s26 = int_to_ptr.vmem [resolvable:$true] %s280_s26 }
  0x12   : > { %p2905_p12 = pnand %p3344_p9, %p2521_p11  ;;  %p2678_p0 = scmp.ne.s32.totalorder %s262_s23, %s2677_s27 }
  0x13   : > { %p2685_p3 = scmp.lt.s32.totalorder %s262_s23, %s262_s23  ;;  %p2686_p4 = scmp.lt.s32.totalorder %s2677_s27, %s2677_s27 }
  0x14   : > { %p2668_p13 = pneg %p2905_p12 }
  0x15   : > { %p2687_p7 = por %p2686_p4, %p2685_p3 }
  0x16   : > { %p2680_p1 = pnand %p2678_p0, %p2668_p13 }
  0x18   : > { %p2681_p2 = pneg %p2680_p1 }
  0x1a   : > { %p2688_p8 = pnand %p2687_p7, %p2681_p2 }
  0x1c   : > { %2691 = shalt.err (!%p2688_p8)
}
  0x1d   : > { %s2790_s28 = smov 64   ;;  %s2791_s29 = smov 4  }
  0x1e   : > { %2524 = dma.hbm_to_vmem [thread:$0]  (!%p2905_p12), %s3335_s1, 3072, %s262_s23, [#allocation5], %s2790_s28, %s2790_s28, %s2791_s29  }
  0x1f   : > { %s2703_s17 = scalar_lea.vmem %s281_s26, 3072  ;;  %p2711_p9 = scmp.lt.s32.totalorder %s281_s26, %s281_s26 }
  0x20   : > { %p2704_p11 = scmp.ne.s32.totalorder %s281_s26, %s2703_s17  ;;  %p2712_p6 = scmp.lt.s32.totalorder %s2703_s17, %s2703_s17 }
  0x22   : > { %p2706_p0 = pnand %p2704_p11, %p2668_p13  ;;  %p2713_p3 = por %p2712_p6, %p2711_p9 }
  0x24   : > { %p2707_p1 = pneg %p2706_p0 }
  0x26   : > { %p2714_p2 = pnand %p2713_p3, %p2707_p1 }
  0x28   : > { %2717 = shalt.err (!%p2714_p2)
}
  0x29   : > { %2527 = dma.hbm_to_vmem [thread:$0]  (!%p2905_p12), %s3338_s4, 3072, %s281_s26, [#allocation8], %s2790_s28, %s2790_s28, %s2791_s29  }
  0x2a   : > { %318 = sbr.rel (%p2897_p10) target bundleno = 649 (0x289), region = 56  ;;  %p3349_p4 = scmp.eq.s32.totalorder (!%p2897_p10), %s2869_s13, 0 }
  0x2f   : > { %2761 = dma.done.wait (%p3349_p4), [#allocation5], 3072   ;;  %p3350_p13 = pmov %p3349_p4 }
  0x30   : > { %p3351_p7 = pmov %p3349_p4 }
  0x31   : > { %2763 = vsyncadd (%p3350_p13), [#allocation5], 4294964224 }
  0x32   : > { %2765 = dma.done.wait (%p3351_p7), [#allocation8], 3072   ;;  %p3352_p6 = pmov %p3349_p4 }
  0x33   : > { %v2792_v0 = vmov 0.0   ;;  %v2793_v1 = vmov 0   ;;  %vm2794_vm0 = vmmov 0   ;;  %s1947_s21 = sshll.u32 %s2869_s13, 1  ;;  %v2578_v2 = vld [vmem:[#allocation4 + $0x78] sm:$0xff]   ;;  %v2580_v4 = vld [vmem:[#allocation4 + $0x70] sm:$0xff]  }
  0x34   : > { %2767 = vsyncadd (%p3352_p6), [#allocation8], 4294964224  ;;  %2243 = vmatprep.subr.bf16.mxu0 %v2792_v0  ;;  %2279 = vmatprep.subr.bf16.mxu1 %v2792_v0  ;;  %368 = vst [vmem:[#allocation2] sm:$0xf] %v2793_v1  ;;  %v2579_v3 = vld [vmem:[#allocation4 + $0x38] sm:$0xff]   ;;  %p360_p9 = scmp.lt.s32.totalorder %s1947_s21, 3 }
  0x35   : > { %369 = vst [vmem:[#allocation2 + $0x14] sm:$0xf] %v2793_v1  ;;  %400 = vst [vmem:[#allocation2 + $0x28] sm:$0xf] %v2793_v1  ;;  %2259 = vmatprep.mubr.msk.bf16.mxu0 %vm2794_vm0, %v2792_v0  ;;  %2295 = vmatprep.mubr.msk.bf16.mxu1 %vm2794_vm0, %v2792_v0  ;;  %v2581_v5 = vld [vmem:[#allocation4 + $0x30] sm:$0xff]   ;;  %v2582_v6 = vld [vmem:[#allocation4 + $0x68] sm:$0xff]  }
  0x36   : > { %996 = vst [vmem:[#allocation3] sm:$0xf] %v2793_v1  ;;  %997 = vst [vmem:[#allocation3 + $0x14] sm:$0xf] %v2793_v1  ;;  %2244 = vmatpush3.bf16.msra.mxu0 %v2578_v2  ;;  %2280 = vmatpush3.bf16.msra.mxu1 %v2579_v3  ;;  %s3359_s21 = smov (!%p360_p9, %s1947_s21), 3  ;;  %v2583_v7 = vld [vmem:[#allocation4 + $0x28] sm:$0xff]  }
  0x37   : > { %1018 = vst [vmem:[#allocation3 + $0x28] sm:$0xf] %v2793_v1  ;;  %2245 = vmatprep.subr.bf16.mxu0 %v2792_v0  ;;  %2281 = vmatprep.subr.bf16.mxu1 %v2792_v0  ;;  %v2584_v8 = vld [vmem:[#allocation4 + $0x60] sm:$0xff]   ;;  %s2084_s23 = sshll.u32 %s3359_s21, 5  ;;  %v2586_v10 = vld [vmem:[#allocation4 + $0x58] sm:$0xff]   ;;  %vm390_vm1 = vcmask 60416  }
  0x38   : > { %v2585_v9 = vld [vmem:[#allocation4 + $0x20] sm:$0xff]   ;;  %s2959_s27 = scalar_lea.vmem %s3334_s0, %s2084_s23  ;;  %v2587_v11 = vld [vmem:[#allocation4 + $0x18] sm:$0xff]   ;;  %vm395_vm2 = vcmask 1043520   ;;  %v2588_v18 = vld [vmem:[#allocation4 + $0x50] sm:$0xff]   ;;  %vm630_vm3 = vcmask 1044480   ;;  %vm816_vm4 = vcmask 1046528  }
  0x39   : > { %v370_v12 = vld [vmem:[%s2959_s27] sm:$0xff]  ;;  %v371_v13 = vld [vmem:[%s2959_s27 + $0x8] sm:$0xff]  ;;  %v372_v14 = vld [vmem:[%s2959_s27 + $0x10] sm:$0xff]  ;;  %s356_s14 = sand.u32 1, %s2778_s10   ;;  %s2110_s25 = sshll.u32 %s2869_s13, 9 }
  0x3a   : > { %2246 = vmatpush3.bf16.msra.mxu0 %v2580_v4  ;;  %2282 = vmatpush3.bf16.msra.mxu1 %v2581_v5  ;;  %v2085_v15 = vpack.c.bf16 %v370_v12, %v370_v12  ;;  %v2086_v16 = vpack.c.bf16 %v371_v13, %v371_v13  ;;  %v2087_v17 = vpack.c.bf16 %v372_v14, %v372_v14  ;;  %v2589_v19 = vld [vmem:[#allocation4 + $0x10] sm:$0xff]   ;;  %v373_v20 = vld [vmem:[%s2959_s27 + $0x18] sm:$0xff]  ;;  %v1954_v22 = vld [vmem:[%s2959_s27 + $0x20] sm:$0xff]  ;;  %s1946_s16 = sshll.u32 %s356_s14, 5  ;;  %s3289_s24 = scalar_lea.hbm %s3343_s9, %s2110_s25 }
  0x3b   : > { %2247 = vmatprep.subr.bf16.mxu0 %v2792_v0  ;;  %2283 = vmatprep.subr.bf16.mxu1 %v2792_v0  ;;  %v2088_v21 = vpack.c.bf16 %v373_v20, %v373_v20  ;;  %v1955_v23 = vld [vmem:[%s2959_s27 + $0x28] sm:$0xff]  ;;  %v2590_v24 = vld [vmem:[#allocation4 + $0x48] sm:$0xff]   ;;  %v2089_v25 = vpack.c.bf16 %v1954_v22, %v1954_v22  ;;  %v1956_v28 = vld [vmem:[%s2959_s27 + $0x30] sm:$0xff]  ;;  %s3257_s17 = scalar_lea.vmem [#allocation9], %s1946_s16  ;;  %s3294_s26 = scalar_lea.sflag [#allocation6], %s356_s14 }
  0x3c   : > { %391 = vst.msk [vmem:[#allocation2 + $0x4] sm:$0xf] %vm390_vm1, %v2085_v15  ;;  %392 = vst.msk [vmem:[#allocation2 + $0x8] sm:$0xf] %vm390_vm1, %v2086_v16  ;;  %v2090_v26 = vpack.c.bf16 %v1955_v23, %v1955_v23  ;;  %v2591_v27 = vld [vmem:[#allocation4 + $0x8] sm:$0xff]   ;;  %v2592_v29 = vld [vmem:[#allocation4 + $0x40] sm:$0xff]   ;;  %v2091_v31 = vpack.c.bf16 %v1956_v28, %v1956_v28 }
  0x3d   : > { %393 = vst.msk [vmem:[#allocation2 + $0xc] sm:$0xf] %vm390_vm1, %v2087_v17  ;;  %394 = vst.msk [vmem:[#allocation2 + $0x10] sm:$0xf] %vm390_vm1, %v2088_v21  ;;  %v1957_v30 = vld [vmem:[%s2959_s27 + $0x38] sm:$0xff]  ;;  %v2597_v42 = vld [vmem:[#allocation4 + $0xb8] sm:$0xff]  }
  0x3e   : > { %2248 = vmatpush3.bf16.msra.mxu0 %v2582_v6  ;;  %2284 = vmatpush3.bf16.msra.mxu1 %v2583_v7  ;;  %396 = vst.msk [vmem:[#allocation2 + $0x4] sm:$0xf] %vm395_vm2, %v2793_v1  ;;  %397 = vst.msk [vmem:[#allocation2 + $0x8] sm:$0xf] %vm395_vm2, %v2793_v1  ;;  %v430_v32 = vld [vmem:[#allocation2] sm:$0x8]  ;;  %v2092_v33 = vpack.c.bf16 %v1957_v30, %v1957_v30 }
  0x3f   : > { %2249 = vmatprep.subr.bf16.mxu0 %v2792_v0  ;;  %2285 = vmatprep.subr.bf16.mxu1 %v2792_v0  ;;  %398 = vst.msk [vmem:[#allocation2 + $0xc] sm:$0xf] %vm395_vm2, %v2793_v1  ;;  %399 = vst.msk [vmem:[#allocation2 + $0x10] sm:$0xf] %vm395_vm2, %v2793_v1  ;;  %v2593_v34 = vld [vmem:[#allocation4] sm:$0xff]   ;;  %v2598_v50 = vld [vmem:[#allocation4 + $0xb0] sm:$0xff]  }
  0x40   : > { %422 = vst.msk [vmem:[#allocation2 + $0x18] sm:$0xf] %vm390_vm1, %v2089_v25  ;;  %423 = vst.msk [vmem:[#allocation2 + $0x1c] sm:$0xf] %vm390_vm1, %v2090_v26  ;;  %v435_v40 = vld [vmem:[#allocation2 + $0x14] sm:$0xf] }
  0x41   : > { %426 = vst.msk [vmem:[#allocation2 + $0x18] sm:$0xf] %vm395_vm2, %v2793_v1  ;;  %427 = vst.msk [vmem:[#allocation2 + $0x1c] sm:$0xf] %vm395_vm2, %v2793_v1  ;;  %v2600_v57 = vld [vmem:[#allocation4 + $0xa8] sm:$0xff]   ;;  %v2602_v61 = vld [vmem:[#allocation4 + $0xa0] sm:$0xff]  }
  0x42   : > { %2250 = vmatpush3.bf16.msra.mxu0 %v2584_v8  ;;  %2286 = vmatpush3.bf16.msra.mxu1 %v2585_v9  ;;  %424 = vst.msk [vmem:[#allocation2 + $0x20] sm:$0xf] %vm390_vm1, %v2091_v31  ;;  %425 = vst.msk [vmem:[#allocation2 + $0x24] sm:$0xf] %vm390_vm1, %v2092_v33  ;;  %v2603_v62 = vld [vmem:[#allocation4 + $0x98] sm:$0xff]   ;;  %v2605_v2 = vld [vmem:[#allocation4 + $0x90] sm:$0xff]  }
  0x43   : > { %2251 = vmatprep.subr.bf16.mxu0 %v2792_v0  ;;  %2287 = vmatprep.subr.bf16.mxu1 %v2792_v0  ;;  %428 = vst.msk [vmem:[#allocation2 + $0x20] sm:$0xf] %vm395_vm2, %v2793_v1  ;;  %429 = vst.msk [vmem:[#allocation2 + $0x24] sm:$0xf] %vm395_vm2, %v2793_v1  ;;  %v2606_v4 = vld [vmem:[#allocation4 + $0x88] sm:$0xff]   ;;  %v2608_v6 = vld [vmem:[#allocation4 + $0x80] sm:$0xff]  }
  0x44   : > { %v2614_v22 = vld [vmem:[#allocation7 + $0x78] sm:$0xff]   ;;  %v2615_v23 = vld [vmem:[#allocation7 + $0x70] sm:$0xff]   ;;  %v2616_v26 = vld [vmem:[#allocation7 + $0x68] sm:$0xff]   ;;  %s1854_s22 = sshll.u32 %s3257_s17, 4  ;;  %s2795_s13 = smov [#allocation9]   ;;  %s3284_s22 = int_to_ptr.vmem [resolvable:$true] %s1854_s22 }
  0x45   : > { %v431_v35 = vld [vmem:[#allocation2 + $0x4] sm:$0xf]  ;;  %v432_v36 = vld [vmem:[#allocation2 + $0x8] sm:$0xf]  ;;  %v2618_v28 = vld [vmem:[#allocation7 + $0x60] sm:$0xff]   ;;  %s2718_s27 = scalar_lea.vmem %s3284_s22, 512 }
  0x46   : > { %2252 = vmatpush3.bf16.msra.mxu0 %v2586_v10  ;;  %2288 = vmatpush3.bf16.msra.mxu1 %v2587_v11  ;;  %v433_v37 = vld [vmem:[#allocation2 + $0xc] sm:$0xf]  ;;  %v1975_v38 = vcombine.low %v430_v32, %v431_v35  ;;  %v1962_v41 = vcombine.low %v431_v35, %v432_v36  ;;  %v434_v45 = vld [vmem:[#allocation2 + $0x10] sm:$0xf]  ;;  %v2609_v8 = vld [vmem:[#allocation2 + $0x4] sm:$0xfe]   ;;  %p2719_p10 = scmp.ne.s32.totalorder %s3284_s22, %s2718_s27 }
  0x47   : > { %2253 = vmatprep.subr.bf16.mxu0 %v2792_v0  ;;  %2289 = vmatprep.subr.bf16.mxu1 %v2792_v0  ;;  %v1976_v39 = vcombine.low %v432_v36, %v433_v37  ;;  %v1977_v46 = vcombine.low %v434_v45, %v435_v40  ;;  %v1963_v56 = vcombine.low %v433_v37, %v434_v45  ;;  %v2610_v9 = vld [vmem:[#allocation2 + $0xc] sm:$0xff]   ;;  %v817_v10 = vrot.slane %v2609_v8, 1  ;;  %v2628_v35 = vld [vmem:[#allocation7 + $0x8] sm:$0xff]   ;;  %v2627_v36 = vld [vmem:[#allocation7 + $0x40] sm:$0xff]   ;;  %s2722_s28 = sshll.u32 %s2795_s13, 4  ;;  %s2723_s28 = int_to_ptr.vmem [resolvable:$false] %s2722_s28 }
  0x48   : > { %v631_v43 = vrot.slane %v1975_v38, 3  ;;  %v436_v48 = vld [vmem:[#allocation2 + $0x18] sm:$0xf]  ;;  %v437_v49 = vld [vmem:[#allocation2 + $0x1c] sm:$0xf]  ;;  %v818_v11 = vrot.slane %v2610_v9, 1  ;;  %p2720_p12 = pnand %p2719_p10, %p2886_p5  ;;  %p2725_p11 = scmp.lt.s32.totalorder %s3284_s22, %s2723_s28 }
  0x49   : > { %v632_v44 = vrot.slane %v1976_v39, 3  ;;  %v634_v52 = vrot.slane %v1977_v46, 3  ;;  %v1978_v53 = vcombine.low %v436_v48, %v437_v49  ;;  %v1964_v63 = vcombine.low %v435_v40, %v436_v48  ;;  %v2611_v13 = vld [vmem:[#allocation2 + $0x14] sm:$0xff]   ;;  %v2619_v25 = vld [vmem:[#allocation7 + $0x30] sm:$0xff]   ;;  %s2724_s29 = scalar_lea.vmem %s2723_s28, 1024 }
  0x4a   : > { %2254 = vmatpush3.bf16.msra.mxu0 %v2588_v18  ;;  %2290 = vmatpush3.bf16.msra.mxu1 %v2589_v19  ;;  %v438_v51 = vld [vmem:[#allocation2 + $0x20] sm:$0xf]  ;;  %v439_v54 = vld [vmem:[#allocation2 + $0x24] sm:$0x7]  ;;  %v819_v12 = vsel %vm816_vm4, %v817_v10, %v818_v11  ;;  %v820_v14 = vrot.slane %v2611_v13, 1  ;;  %v2621_v30 = vld [vmem:[#allocation7 + $0x58] sm:$0xff]   ;;  %p2721_p8 = pneg %p2720_p12  ;;  %p2726_p0 = scmp.lt.s32.totalorder %s2724_s29, %s2718_s27 }
  0x4b   : > { %2255 = vmatprep.subr.bf16.mxu0 %v2792_v0  ;;  %2291 = vmatprep.subr.bf16.mxu1 %v2792_v0  ;;  %v633_v47 = vsel %vm630_vm3, %v631_v43, %v632_v44  ;;  %v1979_v55 = vcombine.low %v438_v51, %v439_v54  ;;  %v635_v58 = vsel %vm630_vm3, %v632_v44, %v634_v52  ;;  %v636_v59 = vrot.slane %v1978_v53, 3  ;;  %v2607_v7 = vld [vmem:[#allocation2 + $0x24] ss:$0 sps:$4 sm:$0xff]   ;;  %v2612_v16 = vld [vmem:[#allocation2 + $0x1c] sm:$0xff]   ;;  %v2624_v31 = vld [vmem:[#allocation7 + $0x18] sm:$0xff]  }
  0x4c   : > { %v1965_v3 = vcombine.low %v437_v49, %v438_v51  ;;  %v821_v15 = vsel %vm816_vm4, %v818_v11, %v820_v14  ;;  %v822_v17 = vrot.slane %v2612_v16, 1  ;;  %v2613_v19 = vld [vmem:[#allocation2 + $0x24] sm:$0x1f]   ;;  %v2630_v37 = vld [vmem:[#allocation7] sm:$0xff]   ;;  %p2727_p1 = por %p2726_p0, %p2725_p11 }
  0x4d   : > { %v638_v60 = vrot.slane %v1979_v55, 3  ;;  %v637_v1 = vsel %vm630_vm3, %v634_v52, %v636_v59  ;;  %v824_v20 = vrot.slane %v2613_v19, 1  ;;  %v2623_v32 = vld [vmem:[#allocation7 + $0x50] sm:$0xff]   ;;  %v3077_v19 = vld [vmem:[%s3337_s3] ss:$0 sm:$0xff] }
  0x4e   : > { %2256 = vmatpush3.bf16.msra.mxu0 %v2590_v24  ;;  %2292 = vmatpush3.bf16.msra.mxu1 %v2591_v27  ;;  %v823_v18 = vsel %vm816_vm4, %v820_v14, %v822_v17  ;;  %v2617_v24 = vld [vmem:[#allocation7 + $0x38] sm:$0xff]   ;;  %v2620_v27 = vld [vmem:[#allocation7 + $0x28] sm:$0xff]   ;;  %v2626_v33 = vld [vmem:[#allocation7 + $0x10] sm:$0xff]   ;;  %p2728_p3 = pnand %p2727_p1, %p2721_p8 }
  0x4f   : > { %2257 = vmatprep.subr.bf16.mxu0 %v2792_v0  ;;  %2293 = vmatprep.subr.bf16.mxu1 %v2792_v0  ;;  %v639_v5 = vsel %vm630_vm3, %v636_v59, %v638_v60  ;;  %v825_v21 = vsel %vm816_vm4, %v822_v17, %v824_v20  ;;  %v3072_v17 = vld [vmem:[%s3336_s2] ss:$0 sm:$0xff] }
  0x52   : > { %2258 = vmatpush3.bf16.msra.mxu0 %v2592_v29  ;;  %2294 = vmatpush3.bf16.msra.mxu1 %v2593_v34  ;;  %v2622_v29 = vld [vmem:[#allocation7 + $0x20] sm:$0xff]   ;;  %v2625_v34 = vld [vmem:[#allocation7 + $0x48] sm:$0xff]  }
  0x53   : > { %2315 = vmatprep.subr.bf16.mxu0 %v2792_v0  ;;  %2351 = vmatprep.subr.bf16.mxu1 %v2792_v0 }
  0x55   : > { %2260 = vmatmul.mubr.bf16.vlgmr.msra.gmra.mxu0 %v1962_v41  ;;  %2296 = vmatmul.mubr.bf16.vlgmr.msra.gmra.mxu1 %v633_v47 }
  0x56   : > { %2316 = vmatpush3.bf16.msra.mxu0 %v2597_v42  ;;  %2263 = vmatprep.mubr.msk.bf16.mxu0 %vm2794_vm0, %v2792_v0 }
  0x57   : > { %2317 = vmatprep.subr.bf16.mxu0 %v2792_v0  ;;  %2299 = vmatprep.mubr.msk.bf16.mxu1 %vm2794_vm0, %v2792_v0 }
  0x58   : > { %2352 = vmatpush3.bf16.msra.mxu1 %v2614_v22 }
  0x59   : > { %2353 = vmatprep.subr.bf16.mxu1 %v2792_v0 }
  0x5a   : > { %2318 = vmatpush3.bf16.msra.mxu0 %v2598_v50 }
  0x5b   : > { %2319 = vmatprep.subr.bf16.mxu0 %v2792_v0 }
  0x5c   : > { %2354 = vmatpush3.bf16.msra.mxu1 %v2615_v23 }
  0x5d   : > { %2264 = vmatmul.mubr.bf16.gmra.mxu0 %v1963_v56  ;;  %2300 = vmatmul.mubr.bf16.gmra.mxu1 %v635_v58 }
  0x5e   : > { %2320 = vmatpush3.bf16.msra.mxu0 %v2600_v57  ;;  %2267 = vmatprep.mubr.msk.bf16.mxu0 %vm2794_vm0, %v2792_v0 }
  0x5f   : > { %2303 = vmatprep.mubr.msk.bf16.mxu1 %vm2794_vm0, %v2792_v0  ;;  %2321 = vmatprep.subr.bf16.mxu0 %v2792_v0 }
  0x60   : > { %2355 = vmatprep.subr.bf16.mxu1 %v2792_v0 }
  0x61   : > { %2356 = vmatpush3.bf16.msra.mxu1 %v2616_v26 }
  0x62   : > { %2322 = vmatpush3.bf16.msra.mxu0 %v2602_v61  ;;  %2357 = vmatprep.subr.bf16.mxu1 %v2792_v0 }
  0x63   : > { %2323 = vmatprep.subr.bf16.mxu0 %v2792_v0 }
  0x65   : > { %2268 = vmatmul.mubr.bf16.gmra.mxu0 %v1964_v63  ;;  %2304 = vmatmul.mubr.bf16.gmra.mxu1 %v637_v1 }
  0x66   : > { %2324 = vmatpush3.bf16.msra.mxu0 %v2603_v62  ;;  %2271 = vmatprep.mubr.msk.bf16.mxu0 %vm2794_vm0, %v2792_v0 }
  0x67   : > { %2307 = vmatprep.mubr.msk.bf16.mxu1 %vm2794_vm0, %v2792_v0  ;;  %2325 = vmatprep.subr.bf16.mxu0 %v2792_v0 }
  0x68   : > { %2358 = vmatpush3.bf16.msra.mxu1 %v2618_v28 }
  0x69   : > { %2359 = vmatprep.subr.bf16.mxu1 %v2792_v0 }
  0x6a   : > { %2326 = vmatpush3.bf16.msra.mxu0 %v2605_v2 }
  0x6b   : > { %2327 = vmatprep.subr.bf16.mxu0 %v2792_v0 }
  0x6c   : > { %2360 = vmatpush3.bf16.msra.mxu1 %v2621_v30 }
  0x6d   : > { %2272 = vmatmul.mubr.bf16.gmra.mxu0 %v1965_v3  ;;  %2308 = vmatmul.mubr.bf16.gmra.mxu1 %v639_v5 }
  0x6e   : > { %2275 = vmatprep.mubr.msk.bf16.mxu0 %vm2794_vm0, %v2792_v0  ;;  %2328 = vmatpush3.bf16.msra.mxu0 %v2606_v4 }
  0x6f   : > { %2311 = vmatprep.mubr.msk.bf16.mxu1 %vm2794_vm0, %v2792_v0  ;;  %2329 = vmatprep.subr.bf16.mxu0 %v2792_v0 }
  0x70   : > { %2361 = vmatprep.subr.bf16.mxu1 %v2792_v0 }
  0x71   : > { %2362 = vmatpush3.bf16.msra.mxu1 %v2623_v32 }
  0x72   : > { %2330 = vmatpush3.bf16.msra.mxu0 %v2608_v6  ;;  %2363 = vmatprep.subr.bf16.mxu1 %v2792_v0 }
  0x73   : > { %2387 = vmatprep.subr.bf16.mxu0 %v2792_v0 }
  0x75   : > { %2276 = vmatmul.mubr.bf16.gmra.mxu0 %v2607_v7  ;;  %2312 = vmatmul.mubr.bf16.gmra.mxu1 %v638_v60 }
  0x76   : > { %2331 = vmatprep.mubr.msk.bf16.mxu0 %vm2794_vm0, %v2792_v0  ;;  %2367 = vmatprep.mubr.msk.bf16.mxu1 %vm2794_vm0, %v2792_v0 }
  0x77   : > { %2364 = vmatpush3.bf16.msra.mxu1 %v2625_v34 }
  0x78   : > { %2365 = vmatprep.subr.bf16.mxu1 %v2792_v0 }
  0x7b   : > { %2366 = vmatpush3.bf16.msra.mxu1 %v2627_v36 }
  0x7c   : > { %2423 = vmatprep.subr.bf16.mxu1 %v2792_v0 }
  0x7d   : > { %2332 = vmatmul.mubr.bf16.vlgmr.msra.gmra.mxu0 %v819_v12 }
  0x7e   : > { %2335 = vmatprep.mubr.msk.bf16.mxu0 %vm2794_vm0, %v2792_v0  ;;  %2388 = vmatpush3.bf16.msra.mxu0 %v2617_v24 }
  0x7f   : > { %2389 = vmatprep.subr.bf16.mxu0 %v2792_v0 }
  0x82   : > { %2390 = vmatpush3.bf16.msra.mxu0 %v2619_v25 }
  0x83   : > { %2391 = vmatprep.subr.bf16.mxu0 %v2792_v0 }
  0x85   : > { %2336 = vmatmul.mubr.bf16.gmra.mxu0 %v821_v15 }
  0x86   : > { %2339 = vmatprep.mubr.msk.bf16.mxu0 %vm2794_vm0, %v2792_v0  ;;  %2392 = vmatpush3.bf16.msra.mxu0 %v2620_v27 }
  0x87   : > { %2393 = vmatprep.subr.bf16.mxu0 %v2792_v0 }
  0x8a   : > { %2394 = vmatpush3.bf16.msra.mxu0 %v2622_v29 }
  0x8b   : > { %2395 = vmatprep.subr.bf16.mxu0 %v2792_v0 }
  0x8d   : > { %2340 = vmatmul.mubr.bf16.gmra.mxu0 %v823_v18 }
  0x8e   : > { %2343 = vmatprep.mubr.msk.bf16.mxu0 %vm2794_vm0, %v2792_v0  ;;  %2396 = vmatpush3.bf16.msra.mxu0 %v2624_v31 }
  0x8f   : > { %2397 = vmatprep.subr.bf16.mxu0 %v2792_v0 }
  0x92   : > { %2398 = vmatpush3.bf16.msra.mxu0 %v2626_v33 }
  0x93   : > { %2399 = vmatprep.subr.bf16.mxu0 %v2792_v0 }
  0x95   : > { %2344 = vmatmul.mubr.bf16.gmra.mxu0 %v825_v21 }
  0x96   : > { %2347 = vmatprep.mubr.msk.bf16.mxu0 %vm2794_vm0, %v2792_v0  ;;  %2400 = vmatpush3.bf16.msra.mxu0 %v2628_v35 }
  0x97   : > { %2401 = vmatprep.subr.bf16.mxu0 %v2792_v0 }
  0x9a   : > { %2402 = vmatpush3.bf16.msra.mxu0 %v2630_v37 }
  0x9b   : > { %2459 = vmatprep.subr.bf16.mxu0 %v2792_v0 }
  0x9d   : > { %2348 = vmatmul.mubr.bf16.gmra.mxu0 %v824_v20 }
  0x9e   : > { %2403 = vmatprep.mubr.msk.bf16.mxu0 %vm2794_vm0, %v2792_v0 }
 0x115   : > { %v584_v38 = vpop.f32.mrf.mxu0  ;;  %v727_v39 = vpop.f32.mrf.mxu1 }
 0x116   : > { %v728_v14 = vadd.f32 %v727_v39, %v584_v38 }
 0x117   : > { %v2261_v40 = vpop.f32.mrf.mxu0  ;;  %v2297_v41 = vpop.f32.mrf.mxu1 }
 0x119   : > { %v587_v42 = vpop.f32.mrf.mxu0  ;;  %v730_v43 = vpop.f32.mrf.mxu1 }
 0x11a   : > { %v731_v21 = vadd.f32 %v730_v43, %v587_v42 }
 0x11b   : > { %v2262_v44 = vpop.f32.mrf.mxu0  ;;  %v2298_v45 = vpop.f32.mrf.mxu1 }
 0x11d   : > { %v592_v46 = vpop.f32.mrf.mxu0  ;;  %v735_v47 = vpop.f32.mrf.mxu1 }
 0x11e   : > { %v736_v27 = vadd.f32 %v735_v47, %v592_v46 }
 0x11f   : > { %v2265_v48 = vpop.f32.mrf.mxu0  ;;  %v2301_v49 = vpop.f32.mrf.mxu1 }
 0x121   : > { %v595_v50 = vpop.f32.mrf.mxu0  ;;  %v738_v51 = vpop.f32.mrf.mxu1 }
 0x122   : > { %v739_v34 = vadd.f32 %v738_v51, %v595_v50 }
 0x123   : > { %v2266_v52 = vpop.f32.mrf.mxu0  ;;  %v2302_v53 = vpop.f32.mrf.mxu1 }
 0x125   : > { %v600_v54 = vpop.f32.mrf.mxu0  ;;  %v743_v55 = vpop.f32.mrf.mxu1 }
 0x126   : > { %v1039_v55 = vld [vmem:[#allocation3] sm:$0x8] }
 0x127   : > { %v2269_v56 = vpop.f32.mrf.mxu0  ;;  %v2305_v57 = vpop.f32.mrf.mxu1 }
 0x129   : > { %v602_v58 = vpop.f32.mrf.mxu0  ;;  %v745_v59 = vpop.f32.mrf.mxu1 }
 0x12a   : > { %v746_v48 = vadd.f32 %v745_v59, %v602_v58 }
 0x12b   : > { %v2270_v60 = vpop.f32.mrf.mxu0  ;;  %v2306_v61 = vpop.f32.mrf.mxu1 }
 0x12d   : > { %v607_v62 = vpop.f32.mrf.mxu0  ;;  %v750_v63 = vpop.f32.mrf.mxu1 }
 0x12e   : > { %v751_v56 = vadd.f32 %v750_v63, %v607_v62 }
 0x12f   : > { %v2273_v1 = vpop.f32.mrf.mxu0  ;;  %v2309_v2 = vpop.f32.mrf.mxu1 }
 0x130   : > { %v2631_v1 = vld [vmem:[#allocation7 + $0xb8] sm:$0xff]  }
 0x131   : > { %v610_v3 = vpop.f32.mrf.mxu0  ;;  %v753_v4 = vpop.f32.mrf.mxu1 }
 0x133   : > { %v2274_v5 = vpop.f32.mrf.mxu0  ;;  %v2310_v6 = vpop.f32.mrf.mxu1 }
 0x134   : > { %v754_v5 = vadd.f32 %v753_v4, %v610_v3  ;;  %v3094_v3 = vld [vmem:[%s3341_s7 + $0x38] sm:$0xff]  }
 0x135   : > { %v3065_v7 = vpop.f32.mrf.mxu0  ;;  %v3067_v8 = vpop.f32.mrf.mxu1 }
 0x136   : > { %v759_v4 = vadd.f32 %v3067_v8, %v3065_v7  ;;  %v3109_v8 = vld [vmem:[%s3341_s7 + $0x30] sm:$0xff]  }
 0x137   : > { %v2277_v9 = vpop.f32.mrf.mxu0  ;;  %v2313_v10 = vpop.f32.mrf.mxu1 }
 0x139   : > { %v618_v11 = vpop.f32.mrf.mxu0  ;;  %v761_v12 = vpop.f32.mrf.mxu1 }
 0x13b   : > { %v2278_v13 = vpop.f32.mrf.mxu0  ;;  %v2314_v15 = vpop.f32.mrf.mxu1 }
 0x13d   : > { %v913_v16 = vpop.f32.mrf.mxu0 }
 0x13e   : > { %v950_v18 = vadd.f32 %v913_v16, %v728_v14  ;;  %v1044_v16 = vld [vmem:[#allocation3 + $0x14] sm:$0xf] }
 0x13f   : > { %v2333_v20 = vpop.f32.mrf.mxu0 }
 0x140   : > { %v965_v22 = vmul.f32 %v3072_v17, %v950_v18  ;;  %v2634_v20 = vld [vmem:[#allocation7 + $0xb0] sm:$0xff]  }
 0x141   : > { %v916_v23 = vpop.f32.mrf.mxu0 }
 0x142   : > { %v980_v24 = vadd.f32 %v3077_v19, %v965_v22  ;;  %v951_v25 = vadd.f32 %v916_v23, %v731_v21 }
 0x143   : > { %v2334_v26 = vpop.f32.mrf.mxu0 }
 0x144   : > { %v988_v28 = vmax.f32 %v980_v24, 0.0  ;;  %v966_v29 = vmul.f32 %v3072_v17, %v951_v25 }
 0x145   : > { %v921_v30 = vpop.f32.mrf.mxu0 }
 0x146   : > { %v2093_v31 = vpack.c.bf16 %v988_v28, %v988_v28  ;;  %v952_v32 = vadd.f32 %v921_v30, %v736_v27  ;;  %v981_v35 = vadd.f32 %v3077_v19, %v966_v29  ;;  %v2637_v30 = vld [vmem:[#allocation7 + $0xa8] sm:$0xff]  }
 0x147   : > { %v2337_v33 = vpop.f32.mrf.mxu0 }
 0x148   : > { %1014 = vst [vmem:[#allocation3 + $0x4] sm:$0xf] %v2093_v31  ;;  %v967_v36 = vmul.f32 %v3072_v17, %v952_v32  ;;  %v989_v41 = vmax.f32 %v981_v35, 0.0 }
 0x149   : > { %v924_v37 = vpop.f32.mrf.mxu0 }
 0x14a   : > { %v982_v38 = vadd.f32 %v3077_v19, %v967_v36  ;;  %v953_v39 = vadd.f32 %v924_v37, %v739_v34  ;;  %v3120_v37 = vld [vmem:[%s3341_s7 + $0x28] sm:$0xff]  }
 0x14b   : > { %v2338_v40 = vpop.f32.mrf.mxu0 }
 0x14c   : > { %v990_v42 = vmax.f32 %v982_v38, 0.0  ;;  %v968_v43 = vmul.f32 %v3072_v17, %v953_v39 }
 0x14d   : > { %v929_v44 = vpop.f32.mrf.mxu0 }
 0x14e   : > { %v2114_v45 = vpack.c.bf16 %v990_v42, %v989_v41  ;;  %v983_v46 = vadd.f32 %v3077_v19, %v968_v43  ;;  %v2643_v42 = vld [vmem:[#allocation7 + $0x98] sm:$0xff]   ;;  %v3133_v43 = vld [vmem:[%s3341_s7 + $0x20] sm:$0xff]  }
 0x14f   : > { %v2341_v47 = vpop.f32.mrf.mxu0  ;;  %v1040_v54 = vld [vmem:[#allocation3 + $0x4] sm:$0xf] }
 0x150   : > { %2146 = vst [vmem:[#allocation3 + $0x8] sm:$0xff] %v2114_v45   ;;  %v991_v49 = vmax.f32 %v983_v46, 0.0  ;;  %v2024_v2 = vcombine.low %v1039_v55, %v1040_v54 }
 0x151   : > { %v931_v50 = vpop.f32.mrf.mxu0 }
 0x152   : > { %v2096_v51 = vpack.c.bf16 %v991_v49, %v991_v49  ;;  %v954_v52 = vadd.f32 %v931_v50, %v746_v48  ;;  %v1239_v14 = vrot.slane %v2024_v2, 3  ;;  %v3141_v49 = vld [vmem:[%s3341_s7 + $0x18] sm:$0xff]   ;;  %v2647_v50 = vld [vmem:[#allocation7 + $0x90] sm:$0xff]  }
 0x153   : > { %v2342_v53 = vpop.f32.mrf.mxu0 }
 0x154   : > { %1017 = vst [vmem:[#allocation3 + $0x10] sm:$0xf] %v2096_v51  ;;  %v969_v57 = vmul.f32 %v3072_v17, %v954_v52  ;;  %v2649_v52 = vld [vmem:[#allocation7 + $0x88] sm:$0xff]   ;;  %v3154_v53 = vld [vmem:[%s3341_s7 + $0x10] sm:$0xff]  }
 0x155   : > { %v936_v60 = vpop.f32.mrf.mxu0 }
 0x156   : > { %v955_v61 = vadd.f32 %v936_v60, %v751_v56  ;;  %v984_v59 = vadd.f32 %v3077_v19, %v969_v57 }
 0x157   : > { %v2345_v6 = vpop.f32.mrf.mxu0  ;;  %v1041_v9 = vld [vmem:[#allocation3 + $0x8] sm:$0xf]  ;;  %v1042_v58 = vld [vmem:[#allocation3 + $0xc] sm:$0xf] }
 0x158   : > { %v970_v10 = vmul.f32 %v3072_v17, %v955_v61  ;;  %v2011_v11 = vcombine.low %v1040_v54, %v1041_v9  ;;  %v2025_v12 = vcombine.low %v1041_v9, %v1042_v58  ;;  %v992_v22 = vmax.f32 %v984_v59, 0.0  ;;  %v2654_v61 = vld [vmem:[%s3341_s7 + $0x8] sm:$0xff]  }
 0x159   : > { %v939_v13 = vpop.f32.mrf.mxu0 }
 0x15a   : > { %v985_v62 = vadd.f32 %v3077_v19, %v970_v10  ;;  %v956_v63 = vadd.f32 %v939_v13, %v754_v5  ;;  %2368 = vmatmul.mubr.bf16.vlgmr.msra.gmra.mxu1 %v2011_v11  ;;  %v1240_v15 = vrot.slane %v2025_v12, 3  ;;  %v2657_v5 = vld [vmem:[%s3341_s7] sm:$0xff]  }
 0x15b   : > { %v2346_v18 = vpop.f32.mrf.mxu0  ;;  %2424 = vmatpush3.bf16.msra.mxu1 %v2631_v1  ;;  %2371 = vmatprep.mubr.msk.bf16.mxu1 %vm2794_vm0, %v2792_v0  ;;  %v1043_v21 = vld [vmem:[#allocation3 + $0x10] sm:$0xf]  ;;  %v2658_v12 = vld [vmem:[#allocation2 + $0x4] sm:$0xff]  }
 0x15c   : > { %v993_v23 = vmax.f32 %v985_v62, 0.0  ;;  %v971_v24 = vmul.f32 %v3072_v17, %v956_v63  ;;  %v1241_v25 = vsel %vm630_vm3, %v1239_v14, %v1240_v15  ;;  %2425 = vmatprep.subr.bf16.mxu1 %v2792_v0  ;;  %v2026_v27 = vcombine.low %v1043_v21, %v1044_v16  ;;  %v2653_v1 = vld [vmem:[#allocation7 + $0x80] sm:$0xff]   ;;  %v2660_v14 = vld [vmem:[#allocation2 + $0xc] sm:$0xff]  }
 0x15d   : > { %v944_v26 = vpop.f32.mrf.mxu0  ;;  %2404 = vmatmul.mubr.bf16.vlgmr.msra.gmra.mxu0 %v1241_v25  ;;  %v2012_v33 = vcombine.low %v1042_v58, %v1043_v21  ;;  %v2656_v9 = vld [vmem:[#allocation3 + $0xc] sm:$0xff]   ;;  %v2655_v58 = vld [vmem:[#allocation3 + $0x4] sm:$0xfe]  }
 0x15e   : > { %v2119_v28 = vpack.c.bf16 %v993_v23, %v992_v22  ;;  %v957_v7 = vadd.f32 %v944_v26, %v759_v4  ;;  %2407 = vmatprep.mubr.msk.bf16.mxu0 %vm2794_vm0, %v2792_v0  ;;  %2460 = vmatpush3.bf16.msra.mxu0 %v3094_v3  ;;  %v986_v31 = vadd.f32 %v3077_v19, %v971_v24  ;;  %v1242_v34 = vrot.slane %v2026_v27, 3  ;;  %v2662_v4 = vld [vmem:[#allocation2 + $0x14] sm:$0xff]   ;;  %v2664_v22 = vld [vmem:[#allocation2 + $0x1c] sm:$0xff]   ;;  %v2665_v23 = vld [vmem:[#allocation2 + $0x24] ss:$0 sps:$4 sm:$0xff]  }
 0x15f   : > { %v2349_v29 = vpop.f32.mrf.mxu0  ;;  %2426 = vmatpush3.bf16.msra.mxu1 %v2634_v20  ;;  %2461 = vmatprep.subr.bf16.mxu0 %v2792_v0  ;;  %v1425_v59 = vrot.slane %v2656_v9, 1  ;;  %v1424_v10 = vrot.slane %v2655_v58, 1 }
 0x160   : > { %2147 = vst [vmem:[#allocation3 + $0x18] sm:$0xff] %v2119_v28   ;;  %v972_v32 = vmul.f32 %v3072_v17, %v957_v7  ;;  %2427 = vmatprep.subr.bf16.mxu1 %v2792_v0  ;;  %v2641_v17 = vld [vmem:[#allocation7 + $0xa0] sm:$0xff]   ;;  %v994_v39 = vmax.f32 %v986_v31, 0.0  ;;  %v1243_v41 = vsel %vm630_vm3, %v1240_v15, %v1242_v34 }
 0x161   : > { %v947_v35 = vpop.f32.mrf.mxu0  ;;  %v1426_v11 = vsel %vm816_vm4, %v1424_v10, %v1425_v59  ;;  %v3241_v10 = vld [vmem:[%s3342_s8] ss:$0 sm:$0xff] }
 0x162   : > { %v987_v36 = vadd.f32 %v3077_v19, %v972_v32  ;;  %2372 = vmatmul.mubr.bf16.gmra.mxu1 %v2012_v33  ;;  %2462 = vmatpush3.bf16.msra.mxu0 %v3109_v8 }
 0x163   : > { %v2350_v38 = vpop.f32.mrf.mxu0  ;;  %2428 = vmatpush3.bf16.msra.mxu1 %v2637_v30  ;;  %2375 = vmatprep.mubr.msk.bf16.mxu1 %vm2794_vm0, %v2792_v0 }
 0x164   : > { %v995_v40 = vmax.f32 %v987_v36, 0.0  ;;  %2429 = vmatprep.subr.bf16.mxu1 %v2792_v0  ;;  %2463 = vmatprep.subr.bf16.mxu0 %v2792_v0 }
 0x165   : > { %2408 = vmatmul.mubr.bf16.gmra.mxu0 %v1243_v41 }
 0x166   : > { %v2124_v19 = vpack.c.bf16 %v995_v40, %v994_v39  ;;  %2411 = vmatprep.mubr.msk.bf16.mxu0 %vm2794_vm0, %v2792_v0  ;;  %2464 = vmatpush3.bf16.msra.mxu0 %v3120_v37 }
 0x167   : > { %v1045_v44 = vld [vmem:[#allocation3 + $0x18] sm:$0xf]  ;;  %v1046_v45 = vld [vmem:[#allocation3 + $0x1c] sm:$0xf]  ;;  %2430 = vmatpush3.bf16.msra.mxu1 %v2641_v17  ;;  %2465 = vmatprep.subr.bf16.mxu0 %v2792_v0 }
 0x168   : > { %2148 = vst [vmem:[#allocation3 + $0x20] sm:$0xff] %v2124_v19   ;;  %v2013_v46 = vcombine.low %v1044_v16, %v1045_v44  ;;  %v2027_v47 = vcombine.low %v1045_v44, %v1046_v45  ;;  %2431 = vmatprep.subr.bf16.mxu1 %v2792_v0  ;;  %v2659_v13 = vld [vmem:[#allocation3 + $0x14] sm:$0xff]  }
 0x169   : > { %v1427_v62 = vrot.slane %v2659_v13, 1 }
 0x16a   : > { %2376 = vmatmul.mubr.bf16.gmra.mxu1 %v2013_v46  ;;  %v1244_v48 = vrot.slane %v2027_v47, 3  ;;  %2466 = vmatpush3.bf16.msra.mxu0 %v3133_v43 }
 0x16b   : > { %2432 = vmatpush3.bf16.msra.mxu1 %v2643_v42  ;;  %2379 = vmatprep.mubr.msk.bf16.mxu1 %vm2794_vm0, %v2792_v0  ;;  %v1428_v63 = vsel %vm816_vm4, %v1425_v59, %v1427_v62 }
 0x16c   : > { %v1245_v51 = vsel %vm630_vm3, %v1242_v34, %v1244_v48  ;;  %2433 = vmatprep.subr.bf16.mxu1 %v2792_v0  ;;  %2467 = vmatprep.subr.bf16.mxu0 %v2792_v0 }
 0x16d   : > { %2412 = vmatmul.mubr.bf16.gmra.mxu0 %v1245_v51 }
 0x16e   : > { %2415 = vmatprep.mubr.msk.bf16.mxu0 %vm2794_vm0, %v2792_v0  ;;  %2468 = vmatpush3.bf16.msra.mxu0 %v3141_v49 }
 0x16f   : > { %v1047_v54 = vld [vmem:[#allocation3 + $0x20] sm:$0xf]  ;;  %v1048_v55 = vld [vmem:[#allocation3 + $0x24] sm:$0x7]  ;;  %2434 = vmatpush3.bf16.msra.mxu1 %v2647_v50  ;;  %2469 = vmatprep.subr.bf16.mxu0 %v2792_v0 }
 0x170   : > { %v2014_v56 = vcombine.low %v1046_v45, %v1047_v54  ;;  %v2028_v57 = vcombine.low %v1047_v54, %v1048_v55  ;;  %2435 = vmatprep.subr.bf16.mxu1 %v2792_v0  ;;  %v2651_v6 = vld [vmem:[#allocation3 + $0x24] ss:$0 sps:$4 sm:$0xff]   ;;  %v2661_v15 = vld [vmem:[#allocation3 + $0x1c] sm:$0xff]  }
 0x171   : > { %v1429_v16 = vrot.slane %v2661_v15, 1  ;;  %v2663_v18 = vld [vmem:[#allocation3 + $0x24] sm:$0x1f]  }
 0x172   : > { %2380 = vmatmul.mubr.bf16.gmra.mxu1 %v2014_v56  ;;  %v1246_v60 = vrot.slane %v2028_v57, 3  ;;  %2470 = vmatpush3.bf16.msra.mxu0 %v3154_v53  ;;  %v1431_v20 = vrot.slane %v2663_v18, 1 }
 0x173   : > { %2383 = vmatprep.mubr.msk.bf16.mxu1 %vm2794_vm0, %v2792_v0  ;;  %2436 = vmatpush3.bf16.msra.mxu1 %v2649_v52 }
 0x174   : > { %v1247_v2 = vsel %vm630_vm3, %v1244_v48, %v1246_v60  ;;  %2437 = vmatprep.subr.bf16.mxu1 %v2792_v0  ;;  %2471 = vmatprep.subr.bf16.mxu0 %v2792_v0  ;;  %v1432_v21 = vsel %vm816_vm4, %v1429_v16, %v1431_v20 }
 0x175   : > { %2416 = vmatmul.mubr.bf16.gmra.mxu0 %v1247_v2 }
 0x176   : > { %2419 = vmatprep.mubr.msk.bf16.mxu0 %vm2794_vm0, %v2792_v0  ;;  %2472 = vmatpush3.bf16.msra.mxu0 %v2654_v61 }
 0x177   : > { %2438 = vmatpush3.bf16.msra.mxu1 %v2653_v1  ;;  %2473 = vmatprep.subr.bf16.mxu0 %v2792_v0  ;;  %v3230_v1 = vld [vmem:[%s3339_s5] ss:$0 sm:$0xff] }
 0x178   : > { %2495 = vmatprep.subr.bf16.mxu1 %v2792_v0 }
 0x17a   : > { %2384 = vmatmul.mubr.bf16.gmra.mxu1 %v2651_v6  ;;  %2474 = vmatpush3.bf16.msra.mxu0 %v2657_v5  ;;  %v3235_v6 = vld [vmem:[%s3340_s6] ss:$0 sm:$0xff] }
 0x17b   : > { %2439 = vmatprep.mubr.msk.bf16.mxu1 %vm2794_vm0, %v2792_v0 }
 0x17d   : > { %2420 = vmatmul.mubr.bf16.gmra.mxu0 %v1246_v60 }
 0x17e   : > { %2475 = vmatprep.mubr.msk.bf16.mxu0 %vm2794_vm0, %v2792_v0 }
 0x182   : > { %2440 = vmatmul.mubr.bf16.vlgmr.msra.gmra.mxu1 %v1426_v11 }
 0x183   : > { %2503 = vmatpush3.bf16.msra.mxu1 %v3094_v3  ;;  %2443 = vmatprep.mubr.msk.bf16.mxu1 %vm2794_vm0, %v2792_v0  ;;  %v1430_v3 = vsel %vm816_vm4, %v1427_v62, %v1429_v16 }
 0x184   : > { %2496 = vmatprep.subr.bf16.mxu1 %v2792_v0 }
 0x185   : > { %2476 = vmatmul.mubr.bf16.vlgmr.msra.gmra.mxu0 %v2658_v12 }
 0x186   : > { %2479 = vmatprep.mubr.msk.bf16.mxu0 %vm2794_vm0, %v2792_v0 }
 0x187   : > { %2504 = vmatpush3.bf16.msra.mxu1 %v3109_v8 }
 0x188   : > { %2497 = vmatprep.subr.bf16.mxu1 %v2792_v0 }
 0x18a   : > { %2444 = vmatmul.mubr.bf16.gmra.mxu1 %v1428_v63 }
 0x18b   : > { %2505 = vmatpush3.bf16.msra.mxu1 %v3120_v37  ;;  %2447 = vmatprep.mubr.msk.bf16.mxu1 %vm2794_vm0, %v2792_v0 }
 0x18c   : > { %2498 = vmatprep.subr.bf16.mxu1 %v2792_v0 }
 0x18d   : > { %2480 = vmatmul.mubr.bf16.gmra.mxu0 %v2660_v14 }
 0x18e   : > { %2483 = vmatprep.mubr.msk.bf16.mxu0 %vm2794_vm0, %v2792_v0 }
 0x18f   : > { %2506 = vmatpush3.bf16.msra.mxu1 %v3133_v43 }
 0x190   : > { %2499 = vmatprep.subr.bf16.mxu1 %v2792_v0 }
 0x192   : > { %2448 = vmatmul.mubr.bf16.gmra.mxu1 %v1430_v3 }
 0x193   : > { %2507 = vmatpush3.bf16.msra.mxu1 %v3141_v49  ;;  %2451 = vmatprep.mubr.msk.bf16.mxu1 %vm2794_vm0, %v2792_v0 }
 0x194   : > { %2500 = vmatprep.subr.bf16.mxu1 %v2792_v0 }
 0x195   : > { %2484 = vmatmul.mubr.bf16.gmra.mxu0 %v2662_v4 }
 0x197   : > { %2508 = vmatpush3.bf16.msra.mxu1 %v3154_v53 }
 0x198   : > { %2501 = vmatprep.subr.bf16.mxu1 %v2792_v0 }
 0x19a   : > { %2452 = vmatmul.mubr.bf16.gmra.mxu1 %v1432_v21 }
 0x19b   : > { %2455 = vmatprep.mubr.msk.bf16.mxu1 %vm2794_vm0, %v2792_v0  ;;  %2509 = vmatpush3.bf16.msra.mxu1 %v2654_v61 }
 0x19c   : > { %2502 = vmatprep.subr.bf16.mxu1 %v2792_v0 }
 0x19f   : > { %2510 = vmatpush3.bf16.msra.mxu1 %v2657_v5 }
 0x1a2   : > { %2456 = vmatmul.mubr.bf16.gmra.mxu1 %v1431_v20 }
 0x1a3   : > { %2487 = vmatprep.mubr.msk.bf16.mxu1 %vm2794_vm0, %v2792_v0 }
 0x1aa   : > { %2488 = vmatmul.mubr.bf16.vlgmr.msra.gmra.mxu1 %v2664_v22 }
 0x1ab   : > { %2491 = vmatprep.mubr.msk.bf16.mxu1 %vm2794_vm0, %v2792_v0 }
 0x1b2   : > { %2492 = vmatmul.mubr.bf16.gmra.mxu1 %v2665_v23 }
 0x21a   : > { %v1193_v24 = vpop.f32.mrf.mxu1 }
 0x21c   : > { %v2369_v25 = vpop.f32.mrf.mxu1 }
 0x21d   : > { %v1335_v26 = vpop.f32.mrf.mxu0 }
 0x21e   : > { %v1196_v27 = vpop.f32.mrf.mxu1  ;;  %v1336_v57 = vadd.f32 %v1335_v26, %v1193_v24 }
 0x21f   : > { %v2405_v28 = vpop.f32.mrf.mxu0 }
 0x220   : > { %v2370_v7 = vpop.f32.mrf.mxu1 }
 0x221   : > { %v1338_v8 = vpop.f32.mrf.mxu0 }
 0x222   : > { %v1201_v29 = vpop.f32.mrf.mxu1  ;;  %v1339_v58 = vadd.f32 %v1338_v8, %v1196_v27 }
 0x223   : > { %v2406_v30 = vpop.f32.mrf.mxu0 }
 0x224   : > { %v2373_v31 = vpop.f32.mrf.mxu1 }
 0x225   : > { %v1343_v32 = vpop.f32.mrf.mxu0 }
 0x226   : > { %v1204_v33 = vpop.f32.mrf.mxu1  ;;  %v1344_v16 = vadd.f32 %v1343_v32, %v1201_v29 }
 0x227   : > { %v2409_v34 = vpop.f32.mrf.mxu0 }
 0x228   : > { %v2374_v35 = vpop.f32.mrf.mxu1 }
 0x229   : > { %v1346_v36 = vpop.f32.mrf.mxu0 }
 0x22a   : > { %v1209_v37 = vpop.f32.mrf.mxu1  ;;  %v1347_v27 = vadd.f32 %v1346_v36, %v1204_v33 }
 0x22b   : > { %v2410_v38 = vpop.f32.mrf.mxu0 }
 0x22c   : > { %v2377_v0 = vpop.f32.mrf.mxu1 }
 0x22d   : > { %v1351_v17 = vpop.f32.mrf.mxu0 }
 0x22e   : > { %v3211_v39 = vpop.f32.mrf.mxu1 }
 0x22f   : > { %v2413_v40 = vpop.f32.mrf.mxu0 }
 0x230   : > { %v2378_v41 = vpop.f32.mrf.mxu1 }
 0x231   : > { %v3213_v19 = vpop.f32.mrf.mxu0 }
 0x232   : > { %v3215_v42 = vpop.f32.mrf.mxu1 }
 0x233   : > { %v2414_v43 = vpop.f32.mrf.mxu0 }
 0x234   : > { %v2381_v44 = vpop.f32.mrf.mxu1 }
 0x235   : > { %v3217_v45 = vpop.f32.mrf.mxu0 }
 0x236   : > { %v3219_v46 = vpop.f32.mrf.mxu1 }
 0x237   : > { %v2417_v47 = vpop.f32.mrf.mxu0 }
 0x238   : > { %v2382_v48 = vpop.f32.mrf.mxu1 }
 0x239   : > { %v3221_v49 = vpop.f32.mrf.mxu0 }
 0x23a   : > { %v3223_v50 = vpop.f32.mrf.mxu1 }
 0x23b   : > { %v2418_v51 = vpop.f32.mrf.mxu0 }
 0x23c   : > { %v2385_v52 = vpop.f32.mrf.mxu1 }
 0x23d   : > { %v3225_v53 = vpop.f32.mrf.mxu0 }
 0x23e   : > { %v1227_v54 = vpop.f32.mrf.mxu1 }
 0x23f   : > { %v2421_v55 = vpop.f32.mrf.mxu0 }
 0x240   : > { %v2386_v56 = vpop.f32.mrf.mxu1 }
 0x241   : > { %v1369_v60 = vpop.f32.mrf.mxu0 }
 0x242   : > { %v1520_v61 = vpop.f32.mrf.mxu1 }
 0x243   : > { %v1557_v2 = vadd.f32 %v1520_v61, %v1336_v57  ;;  %v2422_v5 = vpop.f32.mrf.mxu0  ;;  %v1354_v61 = vadd.f32 %v3213_v19, %v3211_v39  ;;  %v1362_v39 = vadd.f32 %v3221_v49, %v3219_v46 }
 0x244   : > { %v2441_v9 = vpop.f32.mrf.mxu1 }
 0x245   : > { %v1572_v59 = vmul.f32 %v3230_v1, %v1557_v2  ;;  %v1745_v11 = vpop.f32.mrf.mxu0 }
 0x246   : > { %v1523_v12 = vpop.f32.mrf.mxu1  ;;  %v1746_v15 = vadd.f32 %v3241_v10, %v1745_v11 }
 0x247   : > { %v1587_v13 = vadd.f32 %v3235_v6, %v1572_v59  ;;  %v1558_v62 = vadd.f32 %v1523_v12, %v1339_v58  ;;  %v2477_v63 = vpop.f32.mrf.mxu0 }
 0x248   : > { %v2442_v14 = vpop.f32.mrf.mxu1 }
 0x249   : > { %v1573_v3 = vmul.f32 %v3230_v1, %v1558_v62  ;;  %v1595_v4 = vmax.f32 %v1587_v13, 0.0  ;;  %v1748_v18 = vpop.f32.mrf.mxu0  ;;  %v1359_v62 = vadd.f32 %v3217_v45, %v3215_v42 }
 0x24a   : > { %v1528_v20 = vpop.f32.mrf.mxu1  ;;  %v1749_v23 = vadd.f32 %v3241_v10, %v1748_v18 }
 0x24b   : > { %v1588_v21 = vadd.f32 %v3235_v6, %v1573_v3  ;;  %v1559_v22 = vadd.f32 %v1528_v20, %v1344_v16  ;;  %v2478_v24 = vpop.f32.mrf.mxu0  ;;  %v1782_v25 = vadd.f32 %v1746_v15, %v1595_v4  ;;  %v1367_v20 = vadd.f32 %v3225_v53, %v3223_v50 }
 0x24c   : > { %v2445_v26 = vpop.f32.mrf.mxu1 }
 0x24d   : > { %v1574_v28 = vmul.f32 %v3230_v1, %v1559_v22  ;;  %v1596_v7 = vmax.f32 %v1588_v21, 0.0  ;;  %v1753_v8 = vpop.f32.mrf.mxu0  ;;  %v1790_v35 = vmax.f32 %v1782_v25, 0.0 }
 0x24e   : > { %v1531_v29 = vpop.f32.mrf.mxu1  ;;  %v1754_v33 = vadd.f32 %v3241_v10, %v1753_v8 }
 0x24f   : > { %v1589_v30 = vadd.f32 %v3235_v6, %v1574_v28  ;;  %v1783_v31 = vadd.f32 %v1749_v23, %v1596_v7  ;;  %v1560_v32 = vadd.f32 %v1531_v29, %v1347_v27  ;;  %v2481_v34 = vpop.f32.mrf.mxu0 }
 0x250   : > { %v2446_v37 = vpop.f32.mrf.mxu1 }
 0x251   : > { %v1791_v38 = vmax.f32 %v1783_v31, 0.0  ;;  %v1575_v0 = vmul.f32 %v3230_v1, %v1560_v32  ;;  %v1597_v17 = vmax.f32 %v1589_v30, 0.0  ;;  %v1756_v36 = vpop.f32.mrf.mxu0 }
 0x252   : > { %v1536_v40 = vpop.f32.mrf.mxu1  ;;  %v1757_v44 = vadd.f32 %v3241_v10, %v1756_v36 }
 0x253   : > { %v2129_v41 = vpack.c.bf16 %v1791_v38, %v1790_v35  ;;  %v1590_v43 = vadd.f32 %v3235_v6, %v1575_v0  ;;  %v2482_v47 = vpop.f32.mrf.mxu0  ;;  %v1784_v51 = vadd.f32 %v1754_v33, %v1597_v17 }
 0x254   : > { %v2449_v48 = vpop.f32.mrf.mxu1 }
 0x255   : > { %2130 = vst [vmem:[%s3257_s17] sm:$0xff] %v2129_v41   ;;  %v1598_v52 = vmax.f32 %v1590_v43, 0.0  ;;  %v1761_v54 = vpop.f32.mrf.mxu0  ;;  %v1792_v2 = vmax.f32 %v1784_v51, 0.0 }
 0x256   : > { %v1538_v55 = vpop.f32.mrf.mxu1 }
 0x257   : > { %v1785_v56 = vadd.f32 %v1757_v44, %v1598_v52  ;;  %v2485_v57 = vpop.f32.mrf.mxu0  ;;  %v1561_v11 = vadd.f32 %v1538_v55, %v1354_v61 }
 0x258   : > { %v2450_v60 = vpop.f32.mrf.mxu1 }
 0x259   : > { %v1793_v5 = vmax.f32 %v1785_v56, 0.0  ;;  %v1763_v9 = vpop.f32.mrf.mxu0  ;;  %v1576_v14 = vmul.f32 %v3230_v1, %v1561_v11 }
 0x25a   : > { %v1543_v58 = vpop.f32.mrf.mxu1  ;;  %v1764_v23 = vadd.f32 %v3241_v10, %v1763_v9 }
 0x25b   : > { %v2134_v59 = vpack.c.bf16 %v1793_v5, %v1792_v2  ;;  %v2486_v12 = vpop.f32.mrf.mxu0  ;;  %v1562_v15 = vadd.f32 %v1543_v58, %v1359_v62  ;;  %v1591_v19 = vadd.f32 %v3235_v6, %v1576_v14 }
 0x25c   : > { %v2453_v13 = vpop.f32.mrf.mxu1 }
 0x25d   : > { %2149 = vst [vmem:[%s3257_s17 + $0x8] sm:$0xff] %v2134_v59   ;;  %v1577_v4 = vmul.f32 %v3230_v1, %v1562_v15  ;;  %v1599_v22 = vmax.f32 %v1591_v19, 0.0 }
 0x25e   : > { %v1546_v63 = vpop.f32.mrf.mxu1 }
 0x25f   : > { %v1563_v21 = vadd.f32 %v1546_v63, %v1362_v39  ;;  %v1592_v45 = vadd.f32 %v3235_v6, %v1577_v4  ;;  %v1786_v49 = vadd.f32 %v1764_v23, %v1599_v22 }
 0x260   : > { %v2454_v16 = vpop.f32.mrf.mxu1 }
 0x261   : > { %v1578_v26 = vmul.f32 %v3230_v1, %v1563_v21  ;;  %v1600_v28 = vmax.f32 %v1592_v45, 0.0  ;;  %v1794_v30 = vmax.f32 %v1786_v49, 0.0 }
 0x262   : > { %v1551_v3 = vpop.f32.mrf.mxu1 }
 0x263   : > { %v1564_v24 = vadd.f32 %v1551_v3, %v1367_v20  ;;  %v1593_v53 = vadd.f32 %v3235_v6, %v1578_v26 }
 0x264   : > { %v2457_v18 = vpop.f32.mrf.mxu1 }
 0x265   : > { %v1579_v27 = vmul.f32 %v3230_v1, %v1564_v24  ;;  %v1601_v38 = vmax.f32 %v1593_v53, 0.0 }
 0x266   : > { %v1554_v42 = vpop.f32.mrf.mxu1 }
 0x267   : > { %v1594_v31 = vadd.f32 %v3235_v6, %v1579_v27 }
 0x268   : > { %v2458_v25 = vpop.f32.mrf.mxu1 }
 0x269   : > { %v1602_v17 = vmax.f32 %v1594_v31, 0.0 }
 0x26a   : > { %v1768_v46 = vpop.f32.mrf.mxu1 }
 0x26b   : > { %v1769_v7 = vadd.f32 %v3241_v10, %v1768_v46 }
 0x26c   : > { %v2489_v50 = vpop.f32.mrf.mxu1 }
 0x26d   : > { %v1787_v8 = vadd.f32 %v1769_v7, %v1600_v28 }
 0x26e   : > { %v1771_v29 = vpop.f32.mrf.mxu1 }
 0x26f   : > { %v1795_v32 = vmax.f32 %v1787_v8, 0.0  ;;  %v1772_v34 = vadd.f32 %v3241_v10, %v1771_v29 }
 0x270   : > { %v2490_v35 = vpop.f32.mrf.mxu1 }
 0x271   : > { %v2139_v37 = vpack.c.bf16 %v1795_v32, %v1794_v30  ;;  %v1788_v0 = vadd.f32 %v1772_v34, %v1601_v38 }
 0x272   : > { %v1776_v1 = vpop.f32.mrf.mxu1 }
 0x273   : > { %2150 = vst [vmem:[%s3257_s17 + $0x10] sm:$0xff] %v2139_v37   ;;  %v1777_v33 = vadd.f32 %v3241_v10, %v1776_v1  ;;  %v1796_v6 = vmax.f32 %v1788_v0, 0.0 }
 0x274   : > { %v2493_v36 = vpop.f32.mrf.mxu1 }
 0x275   : > { %v1789_v40 = vadd.f32 %v1777_v33, %v1602_v17 }
 0x276   : > { %v1779_v41 = vpop.f32.mrf.mxu1 }
 0x277   : > { %v1797_v43 = vmax.f32 %v1789_v40, 0.0 }
 0x278   : > { %v2494_v44 = vpop.f32.mrf.mxu1 }
 0x279   : > { %v2144_v47 = vpack.c.bf16 %v1797_v43, %v1796_v6 }
 0x27b   : > { %2151 = vst [vmem:[%s3257_s17 + $0x18] sm:$0xff] %v2144_v47  }
 0x27c   : > { %2731 = shalt.err (!%p2728_p3)
}
 0x27d   : > { %s2732_s14 = scalar_lea.hbm %s3289_s24, 512  ;;  %s2736_s25 = scalar_lea.hbm %s3343_s9, 1024 }
 0x27e   : > { %p2733_p2 = scmp.ne.s32.totalorder %s3289_s24, %s2732_s14  ;;  %p2737_p7 = scmp.lt.s32.totalorder %s3289_s24, %s3343_s9 }
 0x27f   : > { %p2738_p6 = scmp.lt.s32.totalorder %s2736_s25, %s2732_s14 }
 0x280   : > { %p2734_p4 = pnand %p2733_p2, %p2886_p5 }
 0x281   : > { %p2739_p9 = por %p2738_p6, %p2737_p7 }
 0x282   : > { %p2735_p13 = pneg %p2734_p4 }
 0x284   : > { %p2740_p10 = pnand %p2739_p9, %p2735_p13 }
 0x286   : > { %2743 = shalt.err (!%p2740_p10)
}
 0x287   : > { %s2796_s27 = smov 64   ;;  %s2797_s13 = smov 4  }
 0x288   : > { %2519 = dma.vmem_to_hbm [thread:$0]  (%p2886_p5), %s3284_s22, 512, %s3289_s24, %s3294_s26, %s2796_s27, %s2796_s27, %s2797_s13  }
 0x289 PF: > { %p2536_p12 = scmp.ge.s32.totalorder %s2786_s12, 2  ;;  %s1869_s28 = sand.u32 1, %s2774_s30  }
 0x28a   : > { %p3353_p8 = scmp.ne.s32.totalorder %s3346_s20, 0  ;;  %s1870_s29 = scalar_lea.sflag [#allocation6], %s1869_s28 }
 0x28c   : > { %p2529_p11 = pnand %p2536_p12, %p3353_p8 }
 0x28e   : > { %p2530_p0 = pneg %p2529_p11 }
 0x290   : > { %2769 = dma.done.wait (%p2530_p0), %s1870_s29, 512  }
 0x291   : > { %2771 = vsyncadd (%p2530_p0), %s1870_s29, 4294966784  ;;  %p21_p1 = scmp.ge.s32.totalorder %s2873_s15, 4   ;;  %s3354_s30 = smov %s2778_s10 }
 0x292   : > { %s3355_s10 = smov %s2782_s11  ;;  %s3356_s11 = smov %s2884_s18 }
 0x293   : > { %s3357_s12 = smov %s2873_s15  ;;  %23 = sbr.rel (!%p21_p1) target bundleno = 5 (0x5), region = 106 }
 0x298   :  { %1875 = vsyncpa [#allocation5], 1 }
 0x299   :  { %1877 = vsyncpa [#allocation5 + $0x1], 1 }
 0x29a   :  { %1878 = vsyncpa [#allocation8], 1 }
 0x29b   :  { %1879 = vsyncpa [#allocation6], 1 }
 0x29c   :  { %1881 = vsyncpa [#allocation6 + $0x1], 1 }

</bundles_post_ra>
